<compile_context>
chip_gen: v6e
topology: v6e:2x2x1
jax: 0.10.0
libtpu: 0.0.40
codegen_flags: <defaults>
</compile_context>

<pallas_src>
import functools
import math

import jax
import jax.numpy as jnp
from jax import lax
from jax.experimental import pallas as pl
from jax.experimental.pallas import tpu as pltpu


def _round_up(x, m):
    return (x + m - 1) // m * m


def _nbytes(shape, dt):
    return math.prod(shape) * jnp.dtype(dt).itemsize


def _chip_info():
    """(per-TC VMEM capacity bytes, #TensorCores per chip) with safe fallbacks."""
    vmem_cap = 128 * 1024 * 1024
    num_tc = 1
    try:
        info = pltpu.get_tpu_info()
        vmem_cap = int(getattr(info, "vmem_capacity_bytes", vmem_cap))
    except Exception:
        pass
    try:
        kind = jax.devices()[0].device_kind.lower()
    except Exception:
        kind = ""
    if ("v7" in kind) or ("7x" in kind):      # v7x: 2 TCs, 64 MiB VMEM per TC
        num_tc = 2
        vmem_cap = min(vmem_cap, 64 * 1024 * 1024)
    return vmem_cap, num_tc


_VMEM_CAP, _NUM_TC = _chip_info()


def _gru_kernel(t_chunk, unroll, give_gates,
                gi_ref, h0_ref, whh_ref, bhhn_ref, *refs):
    """One grid step == one (batch shard, time chunk).

    gi_ref   : (T, TB, 3*Hp) bf16  precomputed x@W_ih^T + b_ih (+ b_hh for r,z)
    h0_ref   : (TB, Hp)      f32   initial hidden state for this batch shard
    whh_ref  : (Hp, 3*Hp)    bf16  W_hh^T, gate order [r | z | n]
    bhhn_ref : (1, Hp)       f32   b_hh of the n gate (must stay inside r*(.))
    outputs  : hidden (T, TB, Hp) bf16 [, z, r]
    scratch  : h carry (TB, Hp) f32 (persists across the sequential time axis)
    """
    if give_gates:
        out_ref, z_ref, r_ref, h_acc = refs
    else:
        out_ref, h_acc = refs
        z_ref = r_ref = None

    t_idx = pl.program_id(1)
    tb, hp = h_acc.shape

    @pl.when(t_idx == 0)
    def _():
        h_acc[...] = h0_ref[...]

    # Hoisted out of the per-step serial chain: the (1,Hp)->(TB,Hp) broadcast
    # would otherwise be re-emitted every timestep (JAX doesn't CSE it).
    bhh_n = jnp.broadcast_to(bhhn_ref[...], (tb, hp))

    # Pin W_hh^T in vregs only while it fits comfortably (24 vregs at Hp=128);
    # for Hp >= 256 stream it from VMEM each step (vld slots are idle here).
    hoist_whh = hp < 256
    whh_hoisted = whh_ref[...] if hoist_whh else None

    def step(i, h):
        gi = gi_ref[i].astype(jnp.float32)                      # (TB, 3Hp)
        w = whh_hoisted if hoist_whh else whh_ref[...]
        gh = jnp.dot(h.astype(jnp.bfloat16), w,                 # MXU, f32 accum
                     preferred_element_type=jnp.float32)
        rz = jax.nn.sigmoid(gi[:, :2 * hp] + gh[:, :2 * hp])
        r_t = rz[:, :hp]
        z_t = rz[:, hp:]
        n_t = jnp.tanh(gi[:, 2 * hp:] + r_t * (gh[:, 2 * hp:] + bhh_n))
        h_new = n_t + z_t * (h - n_t)
        out_ref[i] = h_new.astype(out_ref.dtype)
        if give_gates:
            z_ref[i] = z_t.astype(z_ref.dtype)
            r_ref[i] = r_t.astype(r_ref.dtype)
        return h_new

    h_acc[...] = lax.fori_loop(0, t_chunk, step, h_acc[...], unroll=unroll)


@functools.partial(jax.jit, static_argnames=("give_gates",))
def custom_gru_forward(x, init_state, weight_ih, weight_hh, bias_ih, bias_hh,
                       give_gates=False):
    """Pallas implementation of CustomGRU.forward.

    x          : (seq, batch, input_size) f32
    init_state : (1, batch, hidden)       f32
    weight_ih  : (3*hidden, input_size)   weight_hh : (3*hidden, hidden)
    bias_ih    : (3*hidden,)              bias_hh   : (3*hidden,)
    Returns (hidden_states, h_final[, (update_gates, reset_gates)]).
    """
    f32 = jnp.float32
    bf16 = jnp.bfloat16
    x = x.astype(f32)
    init_state = init_state.astype(f32)
    weight_ih = weight_ih.astype(f32)
    weight_hh = weight_hh.astype(f32)
    bias_ih = bias_ih.astype(f32)
    bias_hh = bias_hh.astype(f32)

    seq, B, I = x.shape
    H = weight_hh.shape[1]
    assert weight_ih.shape == (3 * H, I)
    assert init_state.shape == (1, B, H)

    # ---- padded / tiled layout -------------------------------------------
    Hp = _round_up(H, 128)                           # lane-dense gates & stores
    n_batch_shards = 2 if (_NUM_TC >= 2 and B >= 16) else 1
    TB = _round_up((B + n_batch_shards - 1) // n_batch_shards, 8)
    B_pad = TB * n_batch_shards
    n_out = 3 if give_gates else 1

    # ---- VMEM-budget-driven time chunk ------------------------------------
    resident = (2 * _nbytes((Hp, 3 * Hp), bf16)      # W_hh^T (double-buffered)
                + 2 * _nbytes((TB, Hp), f32)         # h0
                + 2 * _nbytes((1, Hp), f32)          # b_hh[n]
                + _nbytes((TB, Hp), f32))            # carry scratch
    per_t = (_nbytes((TB, 3 * Hp), bf16)             # gi per timestep
             + n_out * _nbytes((TB, Hp), bf16))      # outputs per timestep
    budget = min(int(_VMEM_CAP * 0.8), _VMEM_CAP - (16 << 20))
    t_chunk = int(max(1, min(seq, 128, (budget - resident) // (2 * per_t))))
    n_t = -(-seq // t_chunk)
    t_chunk = -(-seq // n_t)                         # rebalance: minimal padding
    seq_pad = n_t * t_chunk
    unroll = True if t_chunk <= 16 else 8

    # ---- hoisted input projection (one big, MXU-friendly matmul) ----------
    # Fold b_ih fully and the r/z parts of b_hh (purely additive); the n part
    # of b_hh must stay inside r * (.) and is applied in-kernel.
    bias_fold = bias_ih + jnp.concatenate([bias_hh[:2 * H], jnp.zeros((H,), f32)])
    gi = jnp.dot(x.reshape(seq * B, I), weight_ih.T,
                 precision=lax.Precision.HIGHEST) + bias_fold       # (seq*B, 3H)
    gi = gi.reshape(seq, B, 3, H)
    gi_p = jnp.zeros((seq_pad, B_pad, 3, Hp), f32).at[:seq, :B, :, :H].set(gi)
    gi_p = gi_p.reshape(seq_pad, B_pad, 3 * Hp).astype(bf16)

    # ---- recurrent weights: W_hh^T, per-gate zero-padded, bf16 ------------
    whh3 = weight_hh.reshape(3, H, H)                    # (gate, out, in)
    whh_t = jnp.transpose(whh3, (2, 0, 1))               # (in, gate, out)
    whh_p = jnp.zeros((Hp, 3, Hp), f32).at[:H, :, :H].set(whh_t)
    whh_p = whh_p.reshape(Hp, 3 * Hp).astype(bf16)

    bhhn_p = jnp.zeros((1, Hp), f32).at[0, :H].set(bias_hh[2 * H:])
    h0_p = jnp.zeros((B_pad, Hp), f32).at[:B, :H].set(init_state[0])

    # ---- pallas_call -------------------------------------------------------
    out_block = (t_chunk, TB, Hp)
    out_shape = tuple(jax.ShapeDtypeStruct((seq_pad, B_pad, Hp), bf16)
                      for _ in range(n_out))
    out_specs = tuple(pl.BlockSpec(out_block, lambda b, t: (t, b, 0))
                      for _ in range(n_out))

    grid_spec = pltpu.PrefetchScalarGridSpec(
        num_scalar_prefetch=0,
        grid=(n_batch_shards, n_t),                # time axis last (sequential)
        in_specs=[
            pl.BlockSpec((t_chunk, TB, 3 * Hp), lambda b, t: (t, b, 0)),  # gi
            pl.BlockSpec((TB, Hp), lambda b, t: (b, 0)),                  # h0
            pl.BlockSpec((Hp, 3 * Hp), lambda b, t: (0, 0)),              # W_hh^T
            pl.BlockSpec((1, Hp), lambda b, t: (0, 0)),                   # b_hh (n)
        ],
        out_specs=out_specs,
        scratch_shapes=[pltpu.VMEM((TB, Hp), f32)],       # hidden-state carry
    )

    # Always set the scoped VMEM limit (v5e default is only 16 MiB); cap with
    # headroom below physical VMEM (<= ~56 MiB on v7x).
    est = resident + 2 * t_chunk * per_t + (1 << 20)
    vmem_limit = int(min(max(est + (4 << 20), 32 << 20), _VMEM_CAP - (8 << 20)))

    cost = pl.CostEstimate(
        flops=2 * seq_pad * B_pad * Hp * 3 * Hp,
        transcendentals=3 * seq_pad * B_pad * Hp,
        bytes_accessed=(gi_p.size * 2 + whh_p.size * 2 + h0_p.size * 4
                        + n_out * seq_pad * B_pad * Hp * 2),
    )

    kernel = functools.partial(_gru_kernel, t_chunk, unroll, give_gates)
    res = pl.pallas_call(
        kernel,
        out_shape=out_shape,
        grid_spec=grid_spec,
        compiler_params=pltpu.CompilerParams(
            dimension_semantics=("parallel", "arbitrary"),
            vmem_limit_bytes=vmem_limit,
        ),
        cost_estimate=cost,
    )(gi_p, h0_p, whh_p, bhhn_p)
    if not isinstance(res, (list, tuple)):
        res = (res,)

    hidden = res[0][:seq, :B, :H].astype(f32)
    h_final = hidden[-1:]                       # (1, B, H), == last hidden state
    if give_gates:
        z_g = res[1][:seq, :B, :H].astype(f32)
        r_g = res[2][:seq, :B, :H].astype(f32)
        return hidden, h_final, (z_g, r_g)
    return hidden, h_final


def _reference_gru(x, init_state, weight_ih, weight_hh, bias_ih, bias_hh):
    """Pure-JAX loop faithful to CustomGRU.forward (f32, HIGHEST precision)."""
    H = weight_hh.shape[1]
    prec = lax.Precision.HIGHEST
    h = init_state[0]
    outs, zs, rs = [], [], []
    for t in range(x.shape[0]):
        gi = jnp.dot(x[t], weight_ih.T, precision=prec) + bias_ih
        gh = jnp.dot(h, weight_hh.T, precision=prec) + bias_hh
        i_r, i_z, i_n = gi[:, :H], gi[:, H:2 * H], gi[:, 2 * H:]
        h_r, h_z, h_n = gh[:, :H], gh[:, H:2 * H], gh[:, 2 * H:]
        r = jax.nn.sigmoid(i_r + h_r)
        z = jax.nn.sigmoid(i_z + h_z)
        n = jnp.tanh(i_n + r * h_n)
        h = n + z * (h - n)
        outs.append(h); zs.append(z); rs.append(r)
    return jnp.stack(outs), h[None], (jnp.stack(zs), jnp.stack(rs))


def _make_params(key, seq, batch, input_size, hidden):
    ks = jax.random.split(key, 6)
    # NOTE: the PyTorch module initializes with k = sqrt(hidden_size); here we
    # use 1/sqrt(hidden_size) purely so the numerical check is well-conditioned
    # (k = sqrt(H) saturates every gate).  Kernel semantics are unaffected.
    k = 1.0 / math.sqrt(hidden)
    weight_ih = jax.random.uniform(ks[0], (3 * hidden, input_size), jnp.float32, -k, k)
    weight_hh = jax.random.uniform(ks[1], (3 * hidden, hidden), jnp.float32, -k, k)
    bias_ih = jax.random.uniform(ks[2], (3 * hidden,), jnp.float32, -k, k)
    bias_hh = jax.random.uniform(ks[3], (3 * hidden,), jnp.float32, -k, k)
    x = jax.random.normal(ks[4], (seq, batch, input_size), jnp.float32)
    init_state = jax.random.normal(ks[5], (1, batch, hidden), jnp.float32)
    return x, init_state, weight_ih, weight_hh, bias_ih, bias_hh


if __name__ == "__main__":
    key1, key2 = jax.random.split(jax.random.PRNGKey(0))
    # Error budget vs the f32 reference: W_hh runs in bf16 on the MXU, h is
    # cast to bf16 for the dot, gi is streamed in bf16 and the stored outputs
    # are bf16 (carry stays f32).  The reference uses the same bf16-rounded
    # W_hh; the remaining differences (gi/h/output rounding, accumulation
    # order) stay well under 3e-2 for these well-conditioned shapes.
    TOL = 3e-2

    # ---- config 1: tiny shapes, give_gates=True ---------------------------
    seq, batch, input_size, hidden = 8, 4, 16, 32
    x, h0, wih, whh, bih, bhh = _make_params(key1, seq, batch, input_size, hidden)
    out, h_t, (z_g, r_g) = custom_gru_forward(x, h0, wih, whh, bih, bhh,
                                              give_gates=True)
    jax.block_until_ready((out, h_t, z_g, r_g))
    assert out.shape == (seq, batch, hidden)
    assert h_t.shape == (1, batch, hidden)

    whh_q = whh.astype(jnp.bfloat16).astype(jnp.float32)   # same rounding as kernel
    ref_out, ref_h, (ref_z, ref_r) = _reference_gru(x, h0, wih, whh_q, bih, bhh)
    for got, ref, name in ((out, ref_out, "hidden"), (h_t, ref_h, "h_final"),
                           (z_g, ref_z, "update"), (r_g, ref_r, "reset")):
        err = float(jnp.max(jnp.abs(got - ref)))
        assert err < TOL, f"{name} mismatch: max|diff|={err}"

    # ---- config 2: unaligned H, non-divisible seq, no gates ---------------
    seq2, batch2, input2, hidden2 = 11, 16, 24, 40
    x2, h02, wih2, whh2, bih2, bhh2 = _make_params(key2, seq2, batch2, input2, hidden2)
    out2, h_t2 = custom_gru_forward(x2, h02, wih2, whh2, bih2, bhh2, give_gates=False)
    jax.block_until_ready((out2, h_t2))
    assert out2.shape == (seq2, batch2, hidden2)
    assert h_t2.shape == (1, batch2, hidden2)

    whh2_q = whh2.astype(jnp.bfloat16).astype(jnp.float32)
    ref_out2, ref_h2, _ = _reference_gru(x2, h02, wih2, whh2_q, bih2, bhh2)
    assert float(jnp.max(jnp.abs(out2 - ref_out2))) < TOL
    assert float(jnp.max(jnp.abs(h_t2 - ref_h2))) < TOL

    print("KERNEL_OK")
</pallas_src>

<mosaic_0001>
module attributes {stable_mosaic.version = 11 : i64} {
  func.func @_gru_kernel(%arg0: i32, %arg1: i32, %arg2: memref<8x8x384xbf16, #tpu.memory_space<vmem>>, %arg3: memref<8x128xf32, #tpu.memory_space<vmem>>, %arg4: memref<128x384xbf16, #tpu.memory_space<vmem>>, %arg5: memref<1x128xf32, #tpu.memory_space<vmem>>, %arg6: memref<8x8x128xbf16, #tpu.memory_space<vmem>>, %arg7: memref<8x8x128xbf16, #tpu.memory_space<vmem>>, %arg8: memref<8x8x128xbf16, #tpu.memory_space<vmem>>, %arg9: memref<8x128xf32, #tpu.memory_space<vmem>>) attributes {dimension_semantics = [#tpu.dimension_semantics<parallel>, #tpu.dimension_semantics<arbitrary>], iteration_bounds = array<i64: 1, 1>, scalar_prefetch = 0 : i64, scratch_operands = 1 : i64, tpu.core_type = #tpu.core_type<tc>, window_params = [{transform_indices = @transform_0, window_bounds = array<i64: 8, 8, 384>}, {transform_indices = @transform_1, window_bounds = array<i64: 8, 128>}, {pipeline_mode = #tpu.pipeline_mode<synchronous>, transform_indices = @transform_2, window_bounds = array<i64: 128, 384>}, {pipeline_mode = #tpu.pipeline_mode<synchronous>, transform_indices = @transform_3, window_bounds = array<i64: 1, 128>}, {transform_indices = @transform_4, window_bounds = array<i64: 8, 8, 128>}, {transform_indices = @transform_5, window_bounds = array<i64: 8, 8, 128>}, {transform_indices = @transform_6, window_bounds = array<i64: 8, 8, 128>}]} {
    %c0_i32 = arith.constant 0 : i32
    %0 = arith.cmpi eq, %arg1, %c0_i32 : i32
    %1 = arith.extui %0 : i1 to i32
    %c0_i32_0 = arith.constant 0 : i32
    %2 = arith.cmpi ne, %1, %c0_i32_0 : i32
    scf.if %2 {
      %c0_88 = arith.constant 0 : index
      %c0_89 = arith.constant 0 : index
      %329 = vector.load %arg3[%c0_88, %c0_89] : memref<8x128xf32, #tpu.memory_space<vmem>>, vector<8x128xf32>
      %c0_90 = arith.constant 0 : index
      %c0_91 = arith.constant 0 : index
      %330 = vector.load %arg9[%c0_90, %c0_91] : memref<8x128xf32, #tpu.memory_space<vmem>>, vector<8x128xf32>
      tpu.vector_store %arg9[%c0_90, %c0_91], %329 {strides = array<i32>} : memref<8x128xf32, #tpu.memory_space<vmem>>, vector<8x128xf32>,
    } else {
    }
    %c0 = arith.constant 0 : index
    %c0_1 = arith.constant 0 : index
    %3 = vector.load %arg5[%c0, %c0_1] : memref<1x128xf32, #tpu.memory_space<vmem>>, vector<1x128xf32>
    %4 = vector.shape_cast %3 : vector<1x128xf32> to vector<1x128xf32>
    %5 = vector.broadcast %4 : vector<1x128xf32> to vector<8x128xf32>
    %c0_2 = arith.constant 0 : index
    %c0_3 = arith.constant 0 : index
    %6 = vector.load %arg4[%c0_2, %c0_3] : memref<128x384xbf16, #tpu.memory_space<vmem>>, vector<128x384xbf16>
    %c0_4 = arith.constant 0 : index
    %c0_5 = arith.constant 0 : index
    %7 = vector.load %arg9[%c0_4, %c0_5] : memref<8x128xf32, #tpu.memory_space<vmem>>, vector<8x128xf32>
    %c0_i32_6 = arith.constant 0 : i32
    %8 = arith.index_cast %c0_i32_6 : i32 to index
    %c0_7 = arith.constant 0 : index
    %c0_8 = arith.constant 0 : index
    %9 = vector.load %arg2[%8, %c0_7, %c0_8] : memref<8x8x384xbf16, #tpu.memory_space<vmem>>, vector<1x8x384xbf16>
    %10 = vector.shape_cast %9 : vector<1x8x384xbf16> to vector<8x384xbf16>
    %11 = arith.extf %10 : vector<8x384xbf16> to vector<8x384xf32>
    %12 = arith.truncf %7 : vector<8x128xf32> to vector<8x128xbf16>
    %cst = arith.constant dense<0.000000e+00> : vector<8x384xf32>
    %13 = tpu.matmul %12, %6, %cst {dimension_numbers = #tpu.dot_dimension_numbers<[1], [0], [0], [1], [0, 0, 1, 1], [], []>} : vector<8x128xbf16>, vector<128x384xbf16>, vector<8x384xf32> -> vector<8x384xf32>
    %14 = vector.extract_strided_slice %11 {offsets = [0, 0], sizes = [8, 256], strides = [1, 1]} : vector<8x384xf32> to vector<8x256xf32>
    %15 = vector.extract_strided_slice %13 {offsets = [0, 0], sizes = [8, 256], strides = [1, 1]} : vector<8x384xf32> to vector<8x256xf32>
    %16 = arith.addf %14, %15 : vector<8x256xf32>
    %17 = arith.negf %16 : vector<8x256xf32>
    %18 = math.exp %17 : vector<8x256xf32>
    %cst_9 = arith.constant 1.000000e+00 : f32
    %19 = vector.broadcast %cst_9 : f32 to vector<8x256xf32>
    %20 = arith.addf %19, %18 : vector<8x256xf32>
    %21 = arith.divf %19, %20 : vector<8x256xf32>
    %22 = vector.extract_strided_slice %21 {offsets = [0, 0], sizes = [8, 128], strides = [1, 1]} : vector<8x256xf32> to vector<8x128xf32>
    %23 = vector.extract_strided_slice %21 {offsets = [0, 128], sizes = [8, 128], strides = [1, 1]} : vector<8x256xf32> to vector<8x128xf32>
    %24 = vector.extract_strided_slice %11 {offsets = [0, 256], sizes = [8, 128], strides = [1, 1]} : vector<8x384xf32> to vector<8x128xf32>
    %25 = vector.extract_strided_slice %13 {offsets = [0, 256], sizes = [8, 128], strides = [1, 1]} : vector<8x384xf32> to vector<8x128xf32>
    %26 = arith.addf %25, %5 : vector<8x128xf32>
    %27 = arith.mulf %22, %26 : vector<8x128xf32>
    %28 = arith.addf %24, %27 : vector<8x128xf32>
    %29 = math.tanh %28 : vector<8x128xf32>
    %30 = arith.subf %7, %29 : vector<8x128xf32>
    %31 = arith.mulf %23, %30 : vector<8x128xf32>
    %32 = arith.addf %29, %31 : vector<8x128xf32>
    %33 = arith.truncf %32 : vector<8x128xf32> to vector<8x128xbf16>
    %34 = arith.index_cast %c0_i32_6 : i32 to index
    %c0_10 = arith.constant 0 : index
    %c0_11 = arith.constant 0 : index
    %35 = vector.load %arg6[%34, %c0_10, %c0_11] : memref<8x8x128xbf16, #tpu.memory_space<vmem>>, vector<1x8x128xbf16>
    %36 = vector.shape_cast %35 : vector<1x8x128xbf16> to vector<8x128xbf16>
    %37 = vector.shape_cast %33 : vector<8x128xbf16> to vector<1x8x128xbf16>
    tpu.vector_store %arg6[%34, %c0_10, %c0_11], %37 {strides = array<i32>} : memref<8x8x128xbf16, #tpu.memory_space<vmem>>, vector<1x8x128xbf16>,
    %38 = arith.truncf %23 : vector<8x128xf32> to vector<8x128xbf16>
    %39 = arith.index_cast %c0_i32_6 : i32 to index
    %c0_12 = arith.constant 0 : index
    %c0_13 = arith.constant 0 : index
    %40 = vector.load %arg7[%39, %c0_12, %c0_13] : memref<8x8x128xbf16, #tpu.memory_space<vmem>>, vector<1x8x128xbf16>
    %41 = vector.shape_cast %40 : vector<1x8x128xbf16> to vector<8x128xbf16>
    %42 = vector.shape_cast %38 : vector<8x128xbf16> to vector<1x8x128xbf16>
    tpu.vector_store %arg7[%39, %c0_12, %c0_13], %42 {strides = array<i32>} : memref<8x8x128xbf16, #tpu.memory_space<vmem>>, vector<1x8x128xbf16>,
    %43 = arith.truncf %22 : vector<8x128xf32> to vector<8x128xbf16>
    %44 = arith.index_cast %c0_i32_6 : i32 to index
    %c0_14 = arith.constant 0 : index
    %c0_15 = arith.constant 0 : index
    %45 = vector.load %arg8[%44, %c0_14, %c0_15] : memref<8x8x128xbf16, #tpu.memory_space<vmem>>, vector<1x8x128xbf16>
    %46 = vector.shape_cast %45 : vector<1x8x128xbf16> to vector<8x128xbf16>
    %47 = vector.shape_cast %43 : vector<8x128xbf16> to vector<1x8x128xbf16>
    tpu.vector_store %arg8[%44, %c0_14, %c0_15], %47 {strides = array<i32>} : memref<8x8x128xbf16, #tpu.memory_space<vmem>>, vector<1x8x128xbf16>,
    %c1_i32 = arith.constant 1 : i32
    %48 = arith.index_cast %c1_i32 : i32 to index
    %c0_16 = arith.constant 0 : index
    %c0_17 = arith.constant 0 : index
    %49 = vector.load %arg2[%48, %c0_16, %c0_17] : memref<8x8x384xbf16, #tpu.memory_space<vmem>>, vector<1x8x384xbf16>
    %50 = vector.shape_cast %49 : vector<1x8x384xbf16> to vector<8x384xbf16>
    %51 = arith.extf %50 : vector<8x384xbf16> to vector<8x384xf32>
    %52 = arith.truncf %32 : vector<8x128xf32> to vector<8x128xbf16>
    %cst_18 = arith.constant dense<0.000000e+00> : vector<8x384xf32>
    %53 = tpu.matmul %52, %6, %cst_18 {dimension_numbers = #tpu.dot_dimension_numbers<[1], [0], [0], [1], [0, 0, 1, 1], [], []>} : vector<8x128xbf16>, vector<128x384xbf16>, vector<8x384xf32> -> vector<8x384xf32>
    %54 = vector.extract_strided_slice %51 {offsets = [0, 0], sizes = [8, 256], strides = [1, 1]} : vector<8x384xf32> to vector<8x256xf32>
    %55 = vector.extract_strided_slice %53 {offsets = [0, 0], sizes = [8, 256], strides = [1, 1]} : vector<8x384xf32> to vector<8x256xf32>
    %56 = arith.addf %54, %55 : vector<8x256xf32>
    %57 = arith.negf %56 : vector<8x256xf32>
    %58 = math.exp %57 : vector<8x256xf32>
    %cst_19 = arith.constant 1.000000e+00 : f32
    %59 = vector.broadcast %cst_19 : f32 to vector<8x256xf32>
    %60 = arith.addf %59, %58 : vector<8x256xf32>
    %61 = arith.divf %59, %60 : vector<8x256xf32>
    %62 = vector.extract_strided_slice %61 {offsets = [0, 0], sizes = [8, 128], strides = [1, 1]} : vector<8x256xf32> to vector<8x128xf32>
    %63 = vector.extract_strided_slice %61 {offsets = [0, 128], sizes = [8, 128], strides = [1, 1]} : vector<8x256xf32> to vector<8x128xf32>
    %64 = vector.extract_strided_slice %51 {offsets = [0, 256], sizes = [8, 128], strides = [1, 1]} : vector<8x384xf32> to vector<8x128xf32>
    %65 = vector.extract_strided_slice %53 {offsets = [0, 256], sizes = [8, 128], strides = [1, 1]} : vector<8x384xf32> to vector<8x128xf32>
    %66 = arith.addf %65, %5 : vector<8x128xf32>
    %67 = arith.mulf %62, %66 : vector<8x128xf32>
    %68 = arith.addf %64, %67 : vector<8x128xf32>
    %69 = math.tanh %68 : vector<8x128xf32>
    %70 = arith.subf %32, %69 : vector<8x128xf32>
    %71 = arith.mulf %63, %70 : vector<8x128xf32>
    %72 = arith.addf %69, %71 : vector<8x128xf32>
    %73 = arith.truncf %72 : vector<8x128xf32> to vector<8x128xbf16>
    %74 = arith.index_cast %c1_i32 : i32 to index
    %c0_20 = arith.constant 0 : index
    %c0_21 = arith.constant 0 : index
    %75 = vector.load %arg6[%74, %c0_20, %c0_21] : memref<8x8x128xbf16, #tpu.memory_space<vmem>>, vector<1x8x128xbf16>
    %76 = vector.shape_cast %75 : vector<1x8x128xbf16> to vector<8x128xbf16>
    %77 = vector.shape_cast %73 : vector<8x128xbf16> to vector<1x8x128xbf16>
    tpu.vector_store %arg6[%74, %c0_20, %c0_21], %77 {strides = array<i32>} : memref<8x8x128xbf16, #tpu.memory_space<vmem>>, vector<1x8x128xbf16>,
    %78 = arith.truncf %63 : vector<8x128xf32> to vector<8x128xbf16>
    %79 = arith.index_cast %c1_i32 : i32 to index
    %c0_22 = arith.constant 0 : index
    %c0_23 = arith.constant 0 : index
    %80 = vector.load %arg7[%79, %c0_22, %c0_23] : memref<8x8x128xbf16, #tpu.memory_space<vmem>>, vector<1x8x128xbf16>
    %81 = vector.shape_cast %80 : vector<1x8x128xbf16> to vector<8x128xbf16>
    %82 = vector.shape_cast %78 : vector<8x128xbf16> to vector<1x8x128xbf16>
    tpu.vector_store %arg7[%79, %c0_22, %c0_23], %82 {strides = array<i32>} : memref<8x8x128xbf16, #tpu.memory_space<vmem>>, vector<1x8x128xbf16>,
    %83 = arith.truncf %62 : vector<8x128xf32> to vector<8x128xbf16>
    %84 = arith.index_cast %c1_i32 : i32 to index
    %c0_24 = arith.constant 0 : index
    %c0_25 = arith.constant 0 : index
    %85 = vector.load %arg8[%84, %c0_24, %c0_25] : memref<8x8x128xbf16, #tpu.memory_space<vmem>>, vector<1x8x128xbf16>
    %86 = vector.shape_cast %85 : vector<1x8x128xbf16> to vector<8x128xbf16>
    %87 = vector.shape_cast %83 : vector<8x128xbf16> to vector<1x8x128xbf16>
    tpu.vector_store %arg8[%84, %c0_24, %c0_25], %87 {strides = array<i32>} : memref<8x8x128xbf16, #tpu.memory_space<vmem>>, vector<1x8x128xbf16>,
    %c2_i32 = arith.constant 2 : i32
    %88 = arith.index_cast %c2_i32 : i32 to index
    %c0_26 = arith.constant 0 : index
    %c0_27 = arith.constant 0 : index
    %89 = vector.load %arg2[%88, %c0_26, %c0_27] : memref<8x8x384xbf16, #tpu.memory_space<vmem>>, vector<1x8x384xbf16>
    %90 = vector.shape_cast %89 : vector<1x8x384xbf16> to vector<8x384xbf16>
    %91 = arith.extf %90 : vector<8x384xbf16> to vector<8x384xf32>
    %92 = arith.truncf %72 : vector<8x128xf32> to vector<8x128xbf16>
    %cst_28 = arith.constant dense<0.000000e+00> : vector<8x384xf32>
    %93 = tpu.matmul %92, %6, %cst_28 {dimension_numbers = #tpu.dot_dimension_numbers<[1], [0], [0], [1], [0, 0, 1, 1], [], []>} : vector<8x128xbf16>, vector<128x384xbf16>, vector<8x384xf32> -> vector<8x384xf32>
    %94 = vector.extract_strided_slice %91 {offsets = [0, 0], sizes = [8, 256], strides = [1, 1]} : vector<8x384xf32> to vector<8x256xf32>
    %95 = vector.extract_strided_slice %93 {offsets = [0, 0], sizes = [8, 256], strides = [1, 1]} : vector<8x384xf32> to vector<8x256xf32>
    %96 = arith.addf %94, %95 : vector<8x256xf32>
    %97 = arith.negf %96 : vector<8x256xf32>
    %98 = math.exp %97 : vector<8x256xf32>
    %cst_29 = arith.constant 1.000000e+00 : f32
    %99 = vector.broadcast %cst_29 : f32 to vector<8x256xf32>
    %100 = arith.addf %99, %98 : vector<8x256xf32>
    %101 = arith.divf %99, %100 : vector<8x256xf32>
    %102 = vector.extract_strided_slice %101 {offsets = [0, 0], sizes = [8, 128], strides = [1, 1]} : vector<8x256xf32> to vector<8x128xf32>
    %103 = vector.extract_strided_slice %101 {offsets = [0, 128], sizes = [8, 128], strides = [1, 1]} : vector<8x256xf32> to vector<8x128xf32>
    %104 = vector.extract_strided_slice %91 {offsets = [0, 256], sizes = [8, 128], strides = [1, 1]} : vector<8x384xf32> to vector<8x128xf32>
    %105 = vector.extract_strided_slice %93 {offsets = [0, 256], sizes = [8, 128], strides = [1, 1]} : vector<8x384xf32> to vector<8x128xf32>
    %106 = arith.addf %105, %5 : vector<8x128xf32>
    %107 = arith.mulf %102, %106 : vector<8x128xf32>
    %108 = arith.addf %104, %107 : vector<8x128xf32>
    %109 = math.tanh %108 : vector<8x128xf32>
    %110 = arith.subf %72, %109 : vector<8x128xf32>
    %111 = arith.mulf %103, %110 : vector<8x128xf32>
    %112 = arith.addf %109, %111 : vector<8x128xf32>
    %113 = arith.truncf %112 : vector<8x128xf32> to vector<8x128xbf16>
    %114 = arith.index_cast %c2_i32 : i32 to index
    %c0_30 = arith.constant 0 : index
    %c0_31 = arith.constant 0 : index
    %115 = vector.load %arg6[%114, %c0_30, %c0_31] : memref<8x8x128xbf16, #tpu.memory_space<vmem>>, vector<1x8x128xbf16>
    %116 = vector.shape_cast %115 : vector<1x8x128xbf16> to vector<8x128xbf16>
    %117 = vector.shape_cast %113 : vector<8x128xbf16> to vector<1x8x128xbf16>
    tpu.vector_store %arg6[%114, %c0_30, %c0_31], %117 {strides = array<i32>} : memref<8x8x128xbf16, #tpu.memory_space<vmem>>, vector<1x8x128xbf16>,
    %118 = arith.truncf %103 : vector<8x128xf32> to vector<8x128xbf16>
    %119 = arith.index_cast %c2_i32 : i32 to index
    %c0_32 = arith.constant 0 : index
    %c0_33 = arith.constant 0 : index
    %120 = vector.load %arg7[%119, %c0_32, %c0_33] : memref<8x8x128xbf16, #tpu.memory_space<vmem>>, vector<1x8x128xbf16>
    %121 = vector.shape_cast %120 : vector<1x8x128xbf16> to vector<8x128xbf16>
    %122 = vector.shape_cast %118 : vector<8x128xbf16> to vector<1x8x128xbf16>
    tpu.vector_store %arg7[%119, %c0_32, %c0_33], %122 {strides = array<i32>} : memref<8x8x128xbf16, #tpu.memory_space<vmem>>, vector<1x8x128xbf16>,
    %123 = arith.truncf %102 : vector<8x128xf32> to vector<8x128xbf16>
    %124 = arith.index_cast %c2_i32 : i32 to index
    %c0_34 = arith.constant 0 : index
    %c0_35 = arith.constant 0 : index
    %125 = vector.load %arg8[%124, %c0_34, %c0_35] : memref<8x8x128xbf16, #tpu.memory_space<vmem>>, vector<1x8x128xbf16>
    %126 = vector.shape_cast %125 : vector<1x8x128xbf16> to vector<8x128xbf16>
    %127 = vector.shape_cast %123 : vector<8x128xbf16> to vector<1x8x128xbf16>
    tpu.vector_store %arg8[%124, %c0_34, %c0_35], %127 {strides = array<i32>} : memref<8x8x128xbf16, #tpu.memory_space<vmem>>, vector<1x8x128xbf16>,
    %c3_i32 = arith.constant 3 : i32
    %128 = arith.index_cast %c3_i32 : i32 to index
    %c0_36 = arith.constant 0 : index
    %c0_37 = arith.constant 0 : index
    %129 = vector.load %arg2[%128, %c0_36, %c0_37] : memref<8x8x384xbf16, #tpu.memory_space<vmem>>, vector<1x8x384xbf16>
    %130 = vector.shape_cast %129 : vector<1x8x384xbf16> to vector<8x384xbf16>
    %131 = arith.extf %130 : vector<8x384xbf16> to vector<8x384xf32>
    %132 = arith.truncf %112 : vector<8x128xf32> to vector<8x128xbf16>
    %cst_38 = arith.constant dense<0.000000e+00> : vector<8x384xf32>
    %133 = tpu.matmul %132, %6, %cst_38 {dimension_numbers = #tpu.dot_dimension_numbers<[1], [0], [0], [1], [0, 0, 1, 1], [], []>} : vector<8x128xbf16>, vector<128x384xbf16>, vector<8x384xf32> -> vector<8x384xf32>
    %134 = vector.extract_strided_slice %131 {offsets = [0, 0], sizes = [8, 256], strides = [1, 1]} : vector<8x384xf32> to vector<8x256xf32>
    %135 = vector.extract_strided_slice %133 {offsets = [0, 0], sizes = [8, 256], strides = [1, 1]} : vector<8x384xf32> to vector<8x256xf32>
    %136 = arith.addf %134, %135 : vector<8x256xf32>
    %137 = arith.negf %136 : vector<8x256xf32>
    %138 = math.exp %137 : vector<8x256xf32>
    %cst_39 = arith.constant 1.000000e+00 : f32
    %139 = vector.broadcast %cst_39 : f32 to vector<8x256xf32>
    %140 = arith.addf %139, %138 : vector<8x256xf32>
    %141 = arith.divf %139, %140 : vector<8x256xf32>
    %142 = vector.extract_strided_slice %141 {offsets = [0, 0], sizes = [8, 128], strides = [1, 1]} : vector<8x256xf32> to vector<8x128xf32>
    %143 = vector.extract_strided_slice %141 {offsets = [0, 128], sizes = [8, 128], strides = [1, 1]} : vector<8x256xf32> to vector<8x128xf32>
    %144 = vector.extract_strided_slice %131 {offsets = [0, 256], sizes = [8, 128], strides = [1, 1]} : vector<8x384xf32> to vector<8x128xf32>
    %145 = vector.extract_strided_slice %133 {offsets = [0, 256], sizes = [8, 128], strides = [1, 1]} : vector<8x384xf32> to vector<8x128xf32>
    %146 = arith.addf %145, %5 : vector<8x128xf32>
    %147 = arith.mulf %142, %146 : vector<8x128xf32>
    %148 = arith.addf %144, %147 : vector<8x128xf32>
    %149 = math.tanh %148 : vector<8x128xf32>
    %150 = arith.subf %112, %149 : vector<8x128xf32>
    %151 = arith.mulf %143, %150 : vector<8x128xf32>
    %152 = arith.addf %149, %151 : vector<8x128xf32>
    %153 = arith.truncf %152 : vector<8x128xf32> to vector<8x128xbf16>
    %154 = arith.index_cast %c3_i32 : i32 to index
    %c0_40 = arith.constant 0 : index
    %c0_41 = arith.constant 0 : index
    %155 = vector.load %arg6[%154, %c0_40, %c0_41] : memref<8x8x128xbf16, #tpu.memory_space<vmem>>, vector<1x8x128xbf16>
    %156 = vector.shape_cast %155 : vector<1x8x128xbf16> to vector<8x128xbf16>
    %157 = vector.shape_cast %153 : vector<8x128xbf16> to vector<1x8x128xbf16>
    tpu.vector_store %arg6[%154, %c0_40, %c0_41], %157 {strides = array<i32>} : memref<8x8x128xbf16, #tpu.memory_space<vmem>>, vector<1x8x128xbf16>,
    %158 = arith.truncf %143 : vector<8x128xf32> to vector<8x128xbf16>
    %159 = arith.index_cast %c3_i32 : i32 to index
    %c0_42 = arith.constant 0 : index
    %c0_43 = arith.constant 0 : index
    %160 = vector.load %arg7[%159, %c0_42, %c0_43] : memref<8x8x128xbf16, #tpu.memory_space<vmem>>, vector<1x8x128xbf16>
    %161 = vector.shape_cast %160 : vector<1x8x128xbf16> to vector<8x128xbf16>
    %162 = vector.shape_cast %158 : vector<8x128xbf16> to vector<1x8x128xbf16>
    tpu.vector_store %arg7[%159, %c0_42, %c0_43], %162 {strides = array<i32>} : memref<8x8x128xbf16, #tpu.memory_space<vmem>>, vector<1x8x128xbf16>,
    %163 = arith.truncf %142 : vector<8x128xf32> to vector<8x128xbf16>
    %164 = arith.index_cast %c3_i32 : i32 to index
    %c0_44 = arith.constant 0 : index
    %c0_45 = arith.constant 0 : index
    %165 = vector.load %arg8[%164, %c0_44, %c0_45] : memref<8x8x128xbf16, #tpu.memory_space<vmem>>, vector<1x8x128xbf16>
    %166 = vector.shape_cast %165 : vector<1x8x128xbf16> to vector<8x128xbf16>
    %167 = vector.shape_cast %163 : vector<8x128xbf16> to vector<1x8x128xbf16>
    tpu.vector_store %arg8[%164, %c0_44, %c0_45], %167 {strides = array<i32>} : memref<8x8x128xbf16, #tpu.memory_space<vmem>>, vector<1x8x128xbf16>,
    %c4_i32 = arith.constant 4 : i32
    %168 = arith.index_cast %c4_i32 : i32 to index
    %c0_46 = arith.constant 0 : index
    %c0_47 = arith.constant 0 : index
    %169 = vector.load %arg2[%168, %c0_46, %c0_47] : memref<8x8x384xbf16, #tpu.memory_space<vmem>>, vector<1x8x384xbf16>
    %170 = vector.shape_cast %169 : vector<1x8x384xbf16> to vector<8x384xbf16>
    %171 = arith.extf %170 : vector<8x384xbf16> to vector<8x384xf32>
    %172 = arith.truncf %152 : vector<8x128xf32> to vector<8x128xbf16>
    %cst_48 = arith.constant dense<0.000000e+00> : vector<8x384xf32>
    %173 = tpu.matmul %172, %6, %cst_48 {dimension_numbers = #tpu.dot_dimension_numbers<[1], [0], [0], [1], [0, 0, 1, 1], [], []>} : vector<8x128xbf16>, vector<128x384xbf16>, vector<8x384xf32> -> vector<8x384xf32>
    %174 = vector.extract_strided_slice %171 {offsets = [0, 0], sizes = [8, 256], strides = [1, 1]} : vector<8x384xf32> to vector<8x256xf32>
    %175 = vector.extract_strided_slice %173 {offsets = [0, 0], sizes = [8, 256], strides = [1, 1]} : vector<8x384xf32> to vector<8x256xf32>
    %176 = arith.addf %174, %175 : vector<8x256xf32>
    %177 = arith.negf %176 : vector<8x256xf32>
    %178 = math.exp %177 : vector<8x256xf32>
    %cst_49 = arith.constant 1.000000e+00 : f32
    %179 = vector.broadcast %cst_49 : f32 to vector<8x256xf32>
    %180 = arith.addf %179, %178 : vector<8x256xf32>
    %181 = arith.divf %179, %180 : vector<8x256xf32>
    %182 = vector.extract_strided_slice %181 {offsets = [0, 0], sizes = [8, 128], strides = [1, 1]} : vector<8x256xf32> to vector<8x128xf32>
    %183 = vector.extract_strided_slice %181 {offsets = [0, 128], sizes = [8, 128], strides = [1, 1]} : vector<8x256xf32> to vector<8x128xf32>
    %184 = vector.extract_strided_slice %171 {offsets = [0, 256], sizes = [8, 128], strides = [1, 1]} : vector<8x384xf32> to vector<8x128xf32>
    %185 = vector.extract_strided_slice %173 {offsets = [0, 256], sizes = [8, 128], strides = [1, 1]} : vector<8x384xf32> to vector<8x128xf32>
    %186 = arith.addf %185, %5 : vector<8x128xf32>
    %187 = arith.mulf %182, %186 : vector<8x128xf32>
    %188 = arith.addf %184, %187 : vector<8x128xf32>
    %189 = math.tanh %188 : vector<8x128xf32>
    %190 = arith.subf %152, %189 : vector<8x128xf32>
    %191 = arith.mulf %183, %190 : vector<8x128xf32>
    %192 = arith.addf %189, %191 : vector<8x128xf32>
    %193 = arith.truncf %192 : vector<8x128xf32> to vector<8x128xbf16>
    %194 = arith.index_cast %c4_i32 : i32 to index
    %c0_50 = arith.constant 0 : index
    %c0_51 = arith.constant 0 : index
    %195 = vector.load %arg6[%194, %c0_50, %c0_51] : memref<8x8x128xbf16, #tpu.memory_space<vmem>>, vector<1x8x128xbf16>
    %196 = vector.shape_cast %195 : vector<1x8x128xbf16> to vector<8x128xbf16>
    %197 = vector.shape_cast %193 : vector<8x128xbf16> to vector<1x8x128xbf16>
    tpu.vector_store %arg6[%194, %c0_50, %c0_51], %197 {strides = array<i32>} : memref<8x8x128xbf16, #tpu.memory_space<vmem>>, vector<1x8x128xbf16>,
    %198 = arith.truncf %183 : vector<8x128xf32> to vector<8x128xbf16>
    %199 = arith.index_cast %c4_i32 : i32 to index
    %c0_52 = arith.constant 0 : index
    %c0_53 = arith.constant 0 : index
    %200 = vector.load %arg7[%199, %c0_52, %c0_53] : memref<8x8x128xbf16, #tpu.memory_space<vmem>>, vector<1x8x128xbf16>
    %201 = vector.shape_cast %200 : vector<1x8x128xbf16> to vector<8x128xbf16>
    %202 = vector.shape_cast %198 : vector<8x128xbf16> to vector<1x8x128xbf16>
    tpu.vector_store %arg7[%199, %c0_52, %c0_53], %202 {strides = array<i32>} : memref<8x8x128xbf16, #tpu.memory_space<vmem>>, vector<1x8x128xbf16>,
    %203 = arith.truncf %182 : vector<8x128xf32> to vector<8x128xbf16>
    %204 = arith.index_cast %c4_i32 : i32 to index
    %c0_54 = arith.constant 0 : index
    %c0_55 = arith.constant 0 : index
    %205 = vector.load %arg8[%204, %c0_54, %c0_55] : memref<8x8x128xbf16, #tpu.memory_space<vmem>>, vector<1x8x128xbf16>
    %206 = vector.shape_cast %205 : vector<1x8x128xbf16> to vector<8x128xbf16>
    %207 = vector.shape_cast %203 : vector<8x128xbf16> to vector<1x8x128xbf16>
    tpu.vector_store %arg8[%204, %c0_54, %c0_55], %207 {strides = array<i32>} : memref<8x8x128xbf16, #tpu.memory_space<vmem>>, vector<1x8x128xbf16>,
    %c5_i32 = arith.constant 5 : i32
    %208 = arith.index_cast %c5_i32 : i32 to index
    %c0_56 = arith.constant 0 : index
    %c0_57 = arith.constant 0 : index
    %209 = vector.load %arg2[%208, %c0_56, %c0_57] : memref<8x8x384xbf16, #tpu.memory_space<vmem>>, vector<1x8x384xbf16>
    %210 = vector.shape_cast %209 : vector<1x8x384xbf16> to vector<8x384xbf16>
    %211 = arith.extf %210 : vector<8x384xbf16> to vector<8x384xf32>
    %212 = arith.truncf %192 : vector<8x128xf32> to vector<8x128xbf16>
    %cst_58 = arith.constant dense<0.000000e+00> : vector<8x384xf32>
    %213 = tpu.matmul %212, %6, %cst_58 {dimension_numbers = #tpu.dot_dimension_numbers<[1], [0], [0], [1], [0, 0, 1, 1], [], []>} : vector<8x128xbf16>, vector<128x384xbf16>, vector<8x384xf32> -> vector<8x384xf32>
    %214 = vector.extract_strided_slice %211 {offsets = [0, 0], sizes = [8, 256], strides = [1, 1]} : vector<8x384xf32> to vector<8x256xf32>
    %215 = vector.extract_strided_slice %213 {offsets = [0, 0], sizes = [8, 256], strides = [1, 1]} : vector<8x384xf32> to vector<8x256xf32>
    %216 = arith.addf %214, %215 : vector<8x256xf32>
    %217 = arith.negf %216 : vector<8x256xf32>
    %218 = math.exp %217 : vector<8x256xf32>
    %cst_59 = arith.constant 1.000000e+00 : f32
    %219 = vector.broadcast %cst_59 : f32 to vector<8x256xf32>
    %220 = arith.addf %219, %218 : vector<8x256xf32>
    %221 = arith.divf %219, %220 : vector<8x256xf32>
    %222 = vector.extract_strided_slice %221 {offsets = [0, 0], sizes = [8, 128], strides = [1, 1]} : vector<8x256xf32> to vector<8x128xf32>
    %223 = vector.extract_strided_slice %221 {offsets = [0, 128], sizes = [8, 128], strides = [1, 1]} : vector<8x256xf32> to vector<8x128xf32>
    %224 = vector.extract_strided_slice %211 {offsets = [0, 256], sizes = [8, 128], strides = [1, 1]} : vector<8x384xf32> to vector<8x128xf32>
    %225 = vector.extract_strided_slice %213 {offsets = [0, 256], sizes = [8, 128], strides = [1, 1]} : vector<8x384xf32> to vector<8x128xf32>
    %226 = arith.addf %225, %5 : vector<8x128xf32>
    %227 = arith.mulf %222, %226 : vector<8x128xf32>
    %228 = arith.addf %224, %227 : vector<8x128xf32>
    %229 = math.tanh %228 : vector<8x128xf32>
    %230 = arith.subf %192, %229 : vector<8x128xf32>
    %231 = arith.mulf %223, %230 : vector<8x128xf32>
    %232 = arith.addf %229, %231 : vector<8x128xf32>
    %233 = arith.truncf %232 : vector<8x128xf32> to vector<8x128xbf16>
    %234 = arith.index_cast %c5_i32 : i32 to index
    %c0_60 = arith.constant 0 : index
    %c0_61 = arith.constant 0 : index
    %235 = vector.load %arg6[%234, %c0_60, %c0_61] : memref<8x8x128xbf16, #tpu.memory_space<vmem>>, vector<1x8x128xbf16>
    %236 = vector.shape_cast %235 : vector<1x8x128xbf16> to vector<8x128xbf16>
    %237 = vector.shape_cast %233 : vector<8x128xbf16> to vector<1x8x128xbf16>
    tpu.vector_store %arg6[%234, %c0_60, %c0_61], %237 {strides = array<i32>} : memref<8x8x128xbf16, #tpu.memory_space<vmem>>, vector<1x8x128xbf16>,
    %238 = arith.truncf %223 : vector<8x128xf32> to vector<8x128xbf16>
    %239 = arith.index_cast %c5_i32 : i32 to index
    %c0_62 = arith.constant 0 : index
    %c0_63 = arith.constant 0 : index
    %240 = vector.load %arg7[%239, %c0_62, %c0_63] : memref<8x8x128xbf16, #tpu.memory_space<vmem>>, vector<1x8x128xbf16>
    %241 = vector.shape_cast %240 : vector<1x8x128xbf16> to vector<8x128xbf16>
    %242 = vector.shape_cast %238 : vector<8x128xbf16> to vector<1x8x128xbf16>
    tpu.vector_store %arg7[%239, %c0_62, %c0_63], %242 {strides = array<i32>} : memref<8x8x128xbf16, #tpu.memory_space<vmem>>, vector<1x8x128xbf16>,
    %243 = arith.truncf %222 : vector<8x128xf32> to vector<8x128xbf16>
    %244 = arith.index_cast %c5_i32 : i32 to index
    %c0_64 = arith.constant 0 : index
    %c0_65 = arith.constant 0 : index
    %245 = vector.load %arg8[%244, %c0_64, %c0_65] : memref<8x8x128xbf16, #tpu.memory_space<vmem>>, vector<1x8x128xbf16>
    %246 = vector.shape_cast %245 : vector<1x8x128xbf16> to vector<8x128xbf16>
    %247 = vector.shape_cast %243 : vector<8x128xbf16> to vector<1x8x128xbf16>
    tpu.vector_store %arg8[%244, %c0_64, %c0_65], %247 {strides = array<i32>} : memref<8x8x128xbf16, #tpu.memory_space<vmem>>, vector<1x8x128xbf16>,
    %c6_i32 = arith.constant 6 : i32
    %248 = arith.index_cast %c6_i32 : i32 to index
    %c0_66 = arith.constant 0 : index
    %c0_67 = arith.constant 0 : index
    %249 = vector.load %arg2[%248, %c0_66, %c0_67] : memref<8x8x384xbf16, #tpu.memory_space<vmem>>, vector<1x8x384xbf16>
    %250 = vector.shape_cast %249 : vector<1x8x384xbf16> to vector<8x384xbf16>
    %251 = arith.extf %250 : vector<8x384xbf16> to vector<8x384xf32>
    %252 = arith.truncf %232 : vector<8x128xf32> to vector<8x128xbf16>
    %cst_68 = arith.constant dense<0.000000e+00> : vector<8x384xf32>
    %253 = tpu.matmul %252, %6, %cst_68 {dimension_numbers = #tpu.dot_dimension_numbers<[1], [0], [0], [1], [0, 0, 1, 1], [], []>} : vector<8x128xbf16>, vector<128x384xbf16>, vector<8x384xf32> -> vector<8x384xf32>
    %254 = vector.extract_strided_slice %251 {offsets = [0, 0], sizes = [8, 256], strides = [1, 1]} : vector<8x384xf32> to vector<8x256xf32>
    %255 = vector.extract_strided_slice %253 {offsets = [0, 0], sizes = [8, 256], strides = [1, 1]} : vector<8x384xf32> to vector<8x256xf32>
    %256 = arith.addf %254, %255 : vector<8x256xf32>
    %257 = arith.negf %256 : vector<8x256xf32>
    %258 = math.exp %257 : vector<8x256xf32>
    %cst_69 = arith.constant 1.000000e+00 : f32
    %259 = vector.broadcast %cst_69 : f32 to vector<8x256xf32>
    %260 = arith.addf %259, %258 : vector<8x256xf32>
    %261 = arith.divf %259, %260 : vector<8x256xf32>
    %262 = vector.extract_strided_slice %261 {offsets = [0, 0], sizes = [8, 128], strides = [1, 1]} : vector<8x256xf32> to vector<8x128xf32>
    %263 = vector.extract_strided_slice %261 {offsets = [0, 128], sizes = [8, 128], strides = [1, 1]} : vector<8x256xf32> to vector<8x128xf32>
    %264 = vector.extract_strided_slice %251 {offsets = [0, 256], sizes = [8, 128], strides = [1, 1]} : vector<8x384xf32> to vector<8x128xf32>
    %265 = vector.extract_strided_slice %253 {offsets = [0, 256], sizes = [8, 128], strides = [1, 1]} : vector<8x384xf32> to vector<8x128xf32>
    %266 = arith.addf %265, %5 : vector<8x128xf32>
    %267 = arith.mulf %262, %266 : vector<8x128xf32>
    %268 = arith.addf %264, %267 : vector<8x128xf32>
    %269 = math.tanh %268 : vector<8x128xf32>
    %270 = arith.subf %232, %269 : vector<8x128xf32>
    %271 = arith.mulf %263, %270 : vector<8x128xf32>
    %272 = arith.addf %269, %271 : vector<8x128xf32>
    %273 = arith.truncf %272 : vector<8x128xf32> to vector<8x128xbf16>
    %274 = arith.index_cast %c6_i32 : i32 to index
    %c0_70 = arith.constant 0 : index
    %c0_71 = arith.constant 0 : index
    %275 = vector.load %arg6[%274, %c0_70, %c0_71] : memref<8x8x128xbf16, #tpu.memory_space<vmem>>, vector<1x8x128xbf16>
    %276 = vector.shape_cast %275 : vector<1x8x128xbf16> to vector<8x128xbf16>
    %277 = vector.shape_cast %273 : vector<8x128xbf16> to vector<1x8x128xbf16>
    tpu.vector_store %arg6[%274, %c0_70, %c0_71], %277 {strides = array<i32>} : memref<8x8x128xbf16, #tpu.memory_space<vmem>>, vector<1x8x128xbf16>,
    %278 = arith.truncf %263 : vector<8x128xf32> to vector<8x128xbf16>
    %279 = arith.index_cast %c6_i32 : i32 to index
    %c0_72 = arith.constant 0 : index
    %c0_73 = arith.constant 0 : index
    %280 = vector.load %arg7[%279, %c0_72, %c0_73] : memref<8x8x128xbf16, #tpu.memory_space<vmem>>, vector<1x8x128xbf16>
    %281 = vector.shape_cast %280 : vector<1x8x128xbf16> to vector<8x128xbf16>
    %282 = vector.shape_cast %278 : vector<8x128xbf16> to vector<1x8x128xbf16>
    tpu.vector_store %arg7[%279, %c0_72, %c0_73], %282 {strides = array<i32>} : memref<8x8x128xbf16, #tpu.memory_space<vmem>>, vector<1x8x128xbf16>,
    %283 = arith.truncf %262 : vector<8x128xf32> to vector<8x128xbf16>
    %284 = arith.index_cast %c6_i32 : i32 to index
    %c0_74 = arith.constant 0 : index
    %c0_75 = arith.constant 0 : index
    %285 = vector.load %arg8[%284, %c0_74, %c0_75] : memref<8x8x128xbf16, #tpu.memory_space<vmem>>, vector<1x8x128xbf16>
    %286 = vector.shape_cast %285 : vector<1x8x128xbf16> to vector<8x128xbf16>
    %287 = vector.shape_cast %283 : vector<8x128xbf16> to vector<1x8x128xbf16>
    tpu.vector_store %arg8[%284, %c0_74, %c0_75], %287 {strides = array<i32>} : memref<8x8x128xbf16, #tpu.memory_space<vmem>>, vector<1x8x128xbf16>,
    %c7_i32 = arith.constant 7 : i32
    %288 = arith.index_cast %c7_i32 : i32 to index
    %c0_76 = arith.constant 0 : index
    %c0_77 = arith.constant 0 : index
    %289 = vector.load %arg2[%288, %c0_76, %c0_77] : memref<8x8x384xbf16, #tpu.memory_space<vmem>>, vector<1x8x384xbf16>
    %290 = vector.shape_cast %289 : vector<1x8x384xbf16> to vector<8x384xbf16>
    %291 = arith.extf %290 : vector<8x384xbf16> to vector<8x384xf32>
    %292 = arith.truncf %272 : vector<8x128xf32> to vector<8x128xbf16>
    %cst_78 = arith.constant dense<0.000000e+00> : vector<8x384xf32>
    %293 = tpu.matmul %292, %6, %cst_78 {dimension_numbers = #tpu.dot_dimension_numbers<[1], [0], [0], [1], [0, 0, 1, 1], [], []>} : vector<8x128xbf16>, vector<128x384xbf16>, vector<8x384xf32> -> vector<8x384xf32>
    %294 = vector.extract_strided_slice %291 {offsets = [0, 0], sizes = [8, 256], strides = [1, 1]} : vector<8x384xf32> to vector<8x256xf32>
    %295 = vector.extract_strided_slice %293 {offsets = [0, 0], sizes = [8, 256], strides = [1, 1]} : vector<8x384xf32> to vector<8x256xf32>
    %296 = arith.addf %294, %295 : vector<8x256xf32>
    %297 = arith.negf %296 : vector<8x256xf32>
    %298 = math.exp %297 : vector<8x256xf32>
    %cst_79 = arith.constant 1.000000e+00 : f32
    %299 = vector.broadcast %cst_79 : f32 to vector<8x256xf32>
    %300 = arith.addf %299, %298 : vector<8x256xf32>
    %301 = arith.divf %299, %300 : vector<8x256xf32>
    %302 = vector.extract_strided_slice %301 {offsets = [0, 0], sizes = [8, 128], strides = [1, 1]} : vector<8x256xf32> to vector<8x128xf32>
    %303 = vector.extract_strided_slice %301 {offsets = [0, 128], sizes = [8, 128], strides = [1, 1]} : vector<8x256xf32> to vector<8x128xf32>
    %304 = vector.extract_strided_slice %291 {offsets = [0, 256], sizes = [8, 128], strides = [1, 1]} : vector<8x384xf32> to vector<8x128xf32>
    %305 = vector.extract_strided_slice %293 {offsets = [0, 256], sizes = [8, 128], strides = [1, 1]} : vector<8x384xf32> to vector<8x128xf32>
    %306 = arith.addf %305, %5 : vector<8x128xf32>
    %307 = arith.mulf %302, %306 : vector<8x128xf32>
    %308 = arith.addf %304, %307 : vector<8x128xf32>
    %309 = math.tanh %308 : vector<8x128xf32>
    %310 = arith.subf %272, %309 : vector<8x128xf32>
    %311 = arith.mulf %303, %310 : vector<8x128xf32>
    %312 = arith.addf %309, %311 : vector<8x128xf32>
    %313 = arith.truncf %312 : vector<8x128xf32> to vector<8x128xbf16>
    %314 = arith.index_cast %c7_i32 : i32 to index
    %c0_80 = arith.constant 0 : index
    %c0_81 = arith.constant 0 : index
    %315 = vector.load %arg6[%314, %c0_80, %c0_81] : memref<8x8x128xbf16, #tpu.memory_space<vmem>>, vector<1x8x128xbf16>
    %316 = vector.shape_cast %315 : vector<1x8x128xbf16> to vector<8x128xbf16>
    %317 = vector.shape_cast %313 : vector<8x128xbf16> to vector<1x8x128xbf16>
    tpu.vector_store %arg6[%314, %c0_80, %c0_81], %317 {strides = array<i32>} : memref<8x8x128xbf16, #tpu.memory_space<vmem>>, vector<1x8x128xbf16>,
    %318 = arith.truncf %303 : vector<8x128xf32> to vector<8x128xbf16>
    %319 = arith.index_cast %c7_i32 : i32 to index
    %c0_82 = arith.constant 0 : index
    %c0_83 = arith.constant 0 : index
    %320 = vector.load %arg7[%319, %c0_82, %c0_83] : memref<8x8x128xbf16, #tpu.memory_space<vmem>>, vector<1x8x128xbf16>
    %321 = vector.shape_cast %320 : vector<1x8x128xbf16> to vector<8x128xbf16>
    %322 = vector.shape_cast %318 : vector<8x128xbf16> to vector<1x8x128xbf16>
    tpu.vector_store %arg7[%319, %c0_82, %c0_83], %322 {strides = array<i32>} : memref<8x8x128xbf16, #tpu.memory_space<vmem>>, vector<1x8x128xbf16>,
    %323 = arith.truncf %302 : vector<8x128xf32> to vector<8x128xbf16>
    %324 = arith.index_cast %c7_i32 : i32 to index
    %c0_84 = arith.constant 0 : index
    %c0_85 = arith.constant 0 : index
    %325 = vector.load %arg8[%324, %c0_84, %c0_85] : memref<8x8x128xbf16, #tpu.memory_space<vmem>>, vector<1x8x128xbf16>
    %326 = vector.shape_cast %325 : vector<1x8x128xbf16> to vector<8x128xbf16>
    %327 = vector.shape_cast %323 : vector<8x128xbf16> to vector<1x8x128xbf16>
    tpu.vector_store %arg8[%324, %c0_84, %c0_85], %327 {strides = array<i32>} : memref<8x8x128xbf16, #tpu.memory_space<vmem>>, vector<1x8x128xbf16>,
    %c8_i32 = arith.constant 8 : i32
    %c0_86 = arith.constant 0 : index
    %c0_87 = arith.constant 0 : index
    %328 = vector.load %arg9[%c0_86, %c0_87] : memref<8x128xf32, #tpu.memory_space<vmem>>, vector<8x128xf32>
    tpu.vector_store %arg9[%c0_86, %c0_87], %312 {strides = array<i32>} : memref<8x128xf32, #tpu.memory_space<vmem>>, vector<8x128xf32>,
    return
  }
  func.func @transform_0(%arg0: i32, %arg1: i32) -> (i32, i32, i32) {
    %c0_i32 = arith.constant 0 : i32
    %c0_i32_0 = arith.constant 0 : i32
    return %arg1, %arg0, %c0_i32 : i32, i32, i32
  }
  func.func @transform_1(%arg0: i32, %arg1: i32) -> (i32, i32) {
    %c0_i32 = arith.constant 0 : i32
    %c0_i32_0 = arith.constant 0 : i32
    return %arg0, %c0_i32 : i32, i32
  }
  func.func @transform_2(%arg0: i32, %arg1: i32) -> (i32, i32) {
    %c0_i32 = arith.constant 0 : i32
    %c0_i32_0 = arith.constant 0 : i32
    %c0_i32_1 = arith.constant 0 : i32
    return %c0_i32, %c0_i32_0 : i32, i32
  }
  func.func @transform_3(%arg0: i32, %arg1: i32) -> (i32, i32) {
    %c0_i32 = arith.constant 0 : i32
    %c0_i32_0 = arith.constant 0 : i32
    %c0_i32_1 = arith.constant 0 : i32
    return %c0_i32, %c0_i32_0 : i32, i32
  }
  func.func @transform_4(%arg0: i32, %arg1: i32) -> (i32, i32, i32) {
    %c0_i32 = arith.constant 0 : i32
    %c0_i32_0 = arith.constant 0 : i32
    return %arg1, %arg0, %c0_i32 : i32, i32, i32
  }
  func.func @transform_5(%arg0: i32, %arg1: i32) -> (i32, i32, i32) {
    %c0_i32 = arith.constant 0 : i32
    %c0_i32_0 = arith.constant 0 : i32
    return %arg1, %arg0, %c0_i32 : i32, i32, i32
  }
  func.func @transform_6(%arg0: i32, %arg1: i32) -> (i32, i32, i32) {
    %c0_i32 = arith.constant 0 : i32
    %c0_i32_0 = arith.constant 0 : i32
    return %arg1, %arg0, %c0_i32 : i32, i32, i32
  }
}

</mosaic_0001>

<bundles_post_ra>
// kernel: custom_gru_forward.1
= control target key start
LH: loop header
LB: loop body
LE: loop exit
PB: predicated region body
PF: predicated region fallthrough
CT: control target
= control target key end

     0   :  { %v1583_v1 = vmov 0.0   ;;  %v1584_v2 = vmov 0   ;;  %vm1585_vm0 = vmmov 0   ;;  %s2233_s2 = inlined_call_operand.vmem [shape: bf16[128,384], index: 2, kind: input, shape index: {}]   ;;  %s2234_s1 = inlined_call_operand.vmem [shape: f32[8,128], index: 1, kind: input, shape index: {}]   ;;  %s2235_s0 = inlined_call_operand.vmem [shape: bf16[8,8,384], index: 0, kind: input, shape index: {}]   ;;  %s2236_s3 = inlined_call_operand.vmem [shape: f32[1,128], index: 3, kind: input, shape index: {}]   ;;  %s2237_s6 = inlined_call_operand.vmem [shape: bf16[8,8,128], index: 6, kind: output, shape index: {2}]   ;;  %s2238_s5 = inlined_call_operand.vmem [shape: bf16[8,8,128], index: 5, kind: output, shape index: {1}]   ;;  %s2239_s4 = inlined_call_operand.vmem [shape: bf16[8,8,128], index: 4, kind: output, shape index: {0}]  }
   0x1   :  { %v1624_v0 = vld [vmem:[%s2233_s2 + $0xac] ss:$12 sps:$4 sm:$0xff]   ;;  %1289 = vmatprep.subr.bf16.mxu1 %v1583_v1  ;;  %233 = vmatprep.mubr.bf16.mxu0 %v1584_v2  ;;  %v1631_v3 = vld [vmem:[%s2233_s2 + $0xa8] ss:$12 sps:$4 sm:$0xff]   ;;  %v1645_v5 = vld [vmem:[%s2233_s2 + $0x90] ss:$12 sps:$4 sm:$0xff]  }
   0x2   :  { %1305 = vmatprep.mubr.msk.bf16.mxu1 %vm1585_vm0, %v1583_v1  ;;  %201 = vmatprep.subr.bf16.mxu0 %v1624_v0  ;;  %v1639_v4 = vld [vmem:[%s2233_s2 + $0x94] ss:$12 sps:$4 sm:$0xff]   ;;  %v1651_v6 = vld [vmem:[%s2233_s2 + $0x7c] ss:$12 sps:$4 sm:$0xff]   ;;  %v1657_v7 = vld [vmem:[%s2233_s2 + $0x78] ss:$12 sps:$4 sm:$0xff]  }
   0x3   :  { %202 = vmatpush1.bf16.msra.mxu0 %v1631_v3  ;;  %v1663_v8 = vld [vmem:[%s2233_s2 + $0x64] ss:$12 sps:$4 sm:$0xff]   ;;  %v1674_v10 = vld [vmem:[%s2233_s2 + $0x60] ss:$12 sps:$4 sm:$0xff]   ;;  %v1692_v13 = vld [vmem:[%s2233_s2 + $0x48] ss:$12 sps:$4 sm:$0xff]  }
   0x4   :  { %203 = vmatprep.subr.bf16.mxu0 %v1639_v4  ;;  %v1668_v9 = vld [vmem:[%s2233_s2 + $0xb0] ss:$12 sps:$4 sm:$0xff]   ;;  %v1680_v11 = vld [vmem:[%s2233_s2 + $0x4c] ss:$12 sps:$4 sm:$0xff]   ;;  %v1698_v14 = vld [vmem:[%s2233_s2 + $0x34] ss:$12 sps:$4 sm:$0xff]  }
   0x5   :  { %1290 = vmatpush3.bf16.msra.mxu1 %v1668_v9  ;;  %v1686_v12 = vld [vmem:[%s2233_s2 + $0x98] ss:$12 sps:$4 sm:$0xff]   ;;  %v1705_v15 = vld [vmem:[%s2233_s2 + $0x80] ss:$12 sps:$4 sm:$0xff]   ;;  %v1712_v16 = vld [vmem:[%s2233_s2 + $0x30] ss:$12 sps:$4 sm:$0xff]  }
   0x6   :  { %1291 = vmatprep.subr.bf16.mxu1 %v1583_v1  ;;  %v1718_v17 = vld [vmem:[%s2233_s2 + $0x1c] ss:$12 sps:$4 sm:$0xff]   ;;  %v1731_v19 = vld [vmem:[%s2233_s2 + $0x18] ss:$12 sps:$4 sm:$0xff]   ;;  %v1750_v22 = vld [vmem:[%s2233_s2] ss:$12 sps:$4 sm:$0xff]  }
   0x7   :  { %204 = vmatpush1.bf16.msra.mxu0 %v1645_v5  ;;  %v1724_v18 = vld [vmem:[%s2233_s2 + $0x68] ss:$12 sps:$4 sm:$0xff]   ;;  %v1737_v20 = vld [vmem:[%s2233_s2 + $0x4] ss:$12 sps:$4 sm:$0xff]   ;;  %v1772_v26 = vld [vmem:[%s2233_s2 + $0x20] ss:$12 sps:$4 sm:$0xff]  }
   0x8   :  { %205 = vmatprep.subr.bf16.mxu0 %v1651_v6  ;;  %v1743_v21 = vld [vmem:[%s2233_s2 + $0x50] ss:$12 sps:$4 sm:$0xff]   ;;  %v1755_v23 = vld [vmem:[%s2234_s1] sm:$0xff]  ;;  %v1782_v27 = vld [vmem:[%s2233_s2 + $0x8] ss:$12 sps:$4 sm:$0xff]  }
   0x9   :  { %1292 = vmatpush3.bf16.msra.mxu1 %v1686_v12  ;;  %v1762_v24 = vld [vmem:[%s2233_s2 + $0x38] ss:$12 sps:$4 sm:$0xff]   ;;  %v72_v25 = vpack.c.bf16 %v1755_v23, %v1755_v23  ;;  %v1826_v47 = vld [vmem:[%s2236_s3] ss:$0 sm:$0xff]  ;;  %v68_v48 = vld [vmem:[%s2235_s0 + $0x8] sm:$0xf] }
   0xa   :  { %1293 = vmatprep.subr.bf16.mxu1 %v1583_v1  ;;  %v67_v28 = vld [vmem:[%s2235_s0] sm:$0xff]  ;;  %v71_v50 = vunpack.c.l.bf16 %v68_v48  ;;  %v1168_v62 = vld [vmem:[%s2235_s0 + $0xc] sm:$0xff] }
   0xb   :  { %206 = vmatpush1.bf16.msra.mxu0 %v1657_v7  ;;  %v69_v29 = vunpack.c.l.bf16 %v67_v28  ;;  %v70_v30 = vunpack.c.h.bf16 %v67_v28  ;;  %v312_v63 = vunpack.c.l.bf16 %v1168_v62 }
   0xc   :  { %207 = vmatprep.subr.bf16.mxu0 %v1663_v8 }
   0xd   :  { %1294 = vmatpush3.bf16.msra.mxu1 %v1705_v15 }
   0xe   :  { %1295 = vmatprep.subr.bf16.mxu1 %v1583_v1 }
   0xf   :  { %208 = vmatpush1.bf16.msra.mxu0 %v1674_v10 }
  0x10   :  { %209 = vmatprep.subr.bf16.mxu0 %v1680_v11 }
  0x11   :  { %1296 = vmatpush3.bf16.msra.mxu1 %v1724_v18 }
  0x12   :  { %1297 = vmatprep.subr.bf16.mxu1 %v1583_v1 }
  0x13   :  { %210 = vmatpush1.bf16.msra.mxu0 %v1692_v13 }
  0x14   :  { %211 = vmatprep.subr.bf16.mxu0 %v1698_v14 }
  0x15   :  { %1298 = vmatpush3.bf16.msra.mxu1 %v1743_v21 }
  0x16   :  { %1299 = vmatprep.subr.bf16.mxu1 %v1583_v1 }
  0x17   :  { %212 = vmatpush1.bf16.msra.mxu0 %v1712_v16 }
  0x18   :  { %213 = vmatprep.subr.bf16.mxu0 %v1718_v17 }
  0x19   :  { %1300 = vmatpush3.bf16.msra.mxu1 %v1762_v24 }
  0x1a   :  { %1301 = vmatprep.subr.bf16.mxu1 %v1583_v1 }
  0x1b   :  { %214 = vmatpush1.bf16.msra.mxu0 %v1731_v19 }
  0x1c   :  { %215 = vmatprep.subr.bf16.mxu0 %v1737_v20 }
  0x1d   :  { %1302 = vmatpush3.bf16.msra.mxu1 %v1772_v26 }
  0x1e   :  { %1303 = vmatprep.subr.bf16.mxu1 %v1583_v1 }
  0x1f   :  { %216 = vmatpush1.bf16.msra.mxu0 %v1750_v22 }
  0x20   :  { %315 = vmatprep.subr.bf16.mxu0 %v1624_v0 }
  0x21   :  { %1304 = vmatpush3.bf16.msra.mxu1 %v1782_v27 }
  0x22   :  { %234 = vmatmul.mubr.bf16.vlgmr.msra.gmra.mxu0 %v72_v25  ;;  %1309 = vmatprep.subr.bf16.mxu1 %v1583_v1 }
  0x23   :  { %316 = vmatpush1.bf16.msra.mxu0 %v1631_v3  ;;  %347 = vmatprep.mubr.bf16.mxu0 %v1584_v2 }
  0x24   :  { %317 = vmatprep.subr.bf16.mxu0 %v1639_v4  ;;  %1306 = vmatmul.mubr.bf16.vlgmr.msra.gmra.mxu1 %v72_v25 }
  0x25   :  { %1310 = vmatpush3.bf16.msra.mxu1 %v1668_v9  ;;  %1325 = vmatprep.mubr.msk.bf16.mxu1 %vm1585_vm0, %v1583_v1 }
  0x26   :  { %1311 = vmatprep.subr.bf16.mxu1 %v1583_v1 }
  0x27   :  { %318 = vmatpush1.bf16.msra.mxu0 %v1645_v5 }
  0x28   :  { %319 = vmatprep.subr.bf16.mxu0 %v1651_v6 }
  0x29   :  { %1312 = vmatpush3.bf16.msra.mxu1 %v1686_v12 }
  0x2a   :  { %1313 = vmatprep.subr.bf16.mxu1 %v1583_v1 }
  0x2b   :  { %320 = vmatpush1.bf16.msra.mxu0 %v1657_v7 }
  0x2c   :  { %321 = vmatprep.subr.bf16.mxu0 %v1663_v8 }
  0x2d   :  { %1314 = vmatpush3.bf16.msra.mxu1 %v1705_v15 }
  0x2e   :  { %1315 = vmatprep.subr.bf16.mxu1 %v1583_v1 }
  0x2f   :  { %322 = vmatpush1.bf16.msra.mxu0 %v1674_v10 }
  0x30   :  { %323 = vmatprep.subr.bf16.mxu0 %v1680_v11 }
  0x31   :  { %1316 = vmatpush3.bf16.msra.mxu1 %v1724_v18 }
  0x32   :  { %1317 = vmatprep.subr.bf16.mxu1 %v1583_v1 }
  0x33   :  { %324 = vmatpush1.bf16.msra.mxu0 %v1692_v13 }
  0x34   :  { %325 = vmatprep.subr.bf16.mxu0 %v1698_v14 }
  0x35   :  { %1318 = vmatpush3.bf16.msra.mxu1 %v1743_v21 }
  0x36   :  { %1319 = vmatprep.subr.bf16.mxu1 %v1583_v1 }
  0x37   :  { %326 = vmatpush1.bf16.msra.mxu0 %v1712_v16 }
  0x38   :  { %327 = vmatprep.subr.bf16.mxu0 %v1718_v17 }
  0x39   :  { %1320 = vmatpush3.bf16.msra.mxu1 %v1762_v24 }
  0x3a   :  { %1321 = vmatprep.subr.bf16.mxu1 %v1583_v1 }
  0x3b   :  { %328 = vmatpush1.bf16.msra.mxu0 %v1731_v19 }
  0x3c   :  { %329 = vmatprep.subr.bf16.mxu0 %v1737_v20 }
  0x3d   :  { %1322 = vmatpush3.bf16.msra.mxu1 %v1772_v26 }
  0x3e   :  { %1323 = vmatprep.subr.bf16.mxu1 %v1583_v1 }
  0x3f   :  { %330 = vmatpush1.bf16.msra.mxu0 %v1750_v22 }
  0x40   :  { %432 = vmatprep.subr.bf16.mxu0 %v1624_v0 }
  0x41   :  { %1324 = vmatpush3.bf16.msra.mxu1 %v1782_v27 }
  0x42   :  { %1329 = vmatprep.subr.bf16.mxu1 %v1583_v1 }
  0xe2   :  { %v235_v31 = vpop.f32.mrf.mxu0 }
  0xe3   :  { %v282_v32 = vadd.f32 %v235_v31, %v69_v29 }
  0xe4   :  { %v237_v33 = vpop.f32.mrf.mxu0  ;;  %v276_v39 = vpop.f32.mrf.mxu1 }
  0xe5   :  { %v1166_v34 = vmul.f32 -1.442695, %v282_v32  ;;  %v283_v35 = vadd.f32 %v237_v33, %v70_v30  ;;  %v296_v49 = vadd.f32 %v1826_v47, %v276_v39 }
  0xe6   :  { %v239_v36 = vpop.f32.mrf.mxu0  ;;  %v1307_v40 = vpop.f32.mrf.mxu1 }
  0xe7   :  { %1484 = vpow2.f32 %v1166_v34  ;;  %v1167_v37 = vmul.f32 -1.442695, %v283_v35 }
  0xe8   :  { %v240_v38 = vpop.f32.mrf.mxu0  ;;  %v279_v41 = vpop.f32.mrf.mxu1 }
  0xe9   :  { %1486 = vpow2.f32 %v1167_v37 }
  0xea   :  { %v1308_v42 = vpop.f32.mrf.mxu1 }
  0xf4   :  { %v1485_v43 = vpop.eup %1484 }
  0xf5   :  { %v290_v44 = vadd.f32 1.0, %v1485_v43  ;;  %v1887_v43 = vld [vmem:[%s2235_s0 + $0x14] ss:$12 sps:$4 sm:$0xff]  }
  0xf6   :  { %v1487_v45 = vpop.eup %1486 }
  0xf7   :  { %1488 = vrcp.f32 %v290_v44  ;;  %v291_v46 = vadd.f32 1.0, %v1487_v45  ;;  %v314_v44 = vunpack.c.l.bf16 %v1887_v43 }
  0xf9   :  { %1490 = vrcp.f32 %v291_v46 }
 0x104   :  { %v1489_v51 = vpop.eup %1488 }
 0x105   :  { %v307_v52 = vpack.c.bf16 %v1489_v51, %v1489_v51  ;;  %v297_v53 = vmul.f32 %v1489_v51, %v296_v49 }
 0x106   :  { %v1491_v54 = vpop.eup %1490 }
 0x107   :  { %308 = vst [vmem:[%s2237_s6] sm:$0xf] %v307_v52  ;;  %v305_v55 = vpack.c.bf16 %v1491_v54, %v1491_v54  ;;  %v298_v56 = vadd.f32 %v297_v53, %v71_v50 }
 0x109   :  { %306 = vst [vmem:[%s2238_s5] sm:$0xf] %v305_v55  ;;  %1492 = vtanh.f32 %v298_v56 }
 0x116   :  { %v1493_v57 = vpop.eup %1492 }
 0x117   :  { %v300_v58 = vsub.f32 %v1755_v23, %v1493_v57  ;;  %v313_v23 = vunpack.c.h.bf16 %v1168_v62 }
 0x119   :  { %v301_v59 = vmul.f32 %v1491_v54, %v300_v58  ;;  %v1175_v58 = vld [vmem:[%s2235_s0 + $0x18] sm:$0xff] }
 0x11b   :  { %v1839_v60 = vadd.f32 %v1493_v57, %v301_v59  ;;  %v429_v59 = vunpack.c.l.bf16 %v1175_v58 }
 0x11d   :  { %v303_v61 = vpack.c.bf16 %v1839_v60, %v1839_v60 }
 0x11f   :  { %304 = vst [vmem:[%s2239_s4] sm:$0xf] %v303_v61  ;;  %348 = vmatmul.mubr.bf16.vlgmr.msra.gmra.mxu0 %v303_v61  ;;  %1326 = vmatmul.mubr.bf16.vlgmr.msra.gmra.mxu1 %v303_v61 }
 0x120   :  { %433 = vmatpush1.bf16.msra.mxu0 %v1631_v3  ;;  %1330 = vmatpush3.bf16.msra.mxu1 %v1668_v9 }
 0x121   :  { %434 = vmatprep.subr.bf16.mxu0 %v1639_v4  ;;  %1331 = vmatprep.subr.bf16.mxu1 %v1583_v1 }
 0x122   :  { %464 = vmatprep.mubr.bf16.mxu0 %v1584_v2  ;;  %1345 = vmatprep.mubr.msk.bf16.mxu1 %vm1585_vm0, %v1583_v1 }
 0x124   :  { %435 = vmatpush1.bf16.msra.mxu0 %v1645_v5  ;;  %1332 = vmatpush3.bf16.msra.mxu1 %v1686_v12 }
 0x125   :  { %436 = vmatprep.subr.bf16.mxu0 %v1651_v6  ;;  %1333 = vmatprep.subr.bf16.mxu1 %v1583_v1 }
 0x128   :  { %437 = vmatpush1.bf16.msra.mxu0 %v1657_v7  ;;  %1334 = vmatpush3.bf16.msra.mxu1 %v1705_v15 }
 0x129   :  { %438 = vmatprep.subr.bf16.mxu0 %v1663_v8  ;;  %1335 = vmatprep.subr.bf16.mxu1 %v1583_v1 }
 0x12c   :  { %439 = vmatpush1.bf16.msra.mxu0 %v1674_v10  ;;  %1336 = vmatpush3.bf16.msra.mxu1 %v1724_v18 }
 0x12d   :  { %440 = vmatprep.subr.bf16.mxu0 %v1680_v11  ;;  %1337 = vmatprep.subr.bf16.mxu1 %v1583_v1 }
 0x130   :  { %441 = vmatpush1.bf16.msra.mxu0 %v1692_v13  ;;  %1338 = vmatpush3.bf16.msra.mxu1 %v1743_v21 }
 0x131   :  { %442 = vmatprep.subr.bf16.mxu0 %v1698_v14  ;;  %1339 = vmatprep.subr.bf16.mxu1 %v1583_v1 }
 0x134   :  { %443 = vmatpush1.bf16.msra.mxu0 %v1712_v16  ;;  %1340 = vmatpush3.bf16.msra.mxu1 %v1762_v24 }
 0x135   :  { %444 = vmatprep.subr.bf16.mxu0 %v1718_v17  ;;  %1341 = vmatprep.subr.bf16.mxu1 %v1583_v1 }
 0x138   :  { %445 = vmatpush1.bf16.msra.mxu0 %v1731_v19  ;;  %1342 = vmatpush3.bf16.msra.mxu1 %v1772_v26 }
 0x139   :  { %446 = vmatprep.subr.bf16.mxu0 %v1737_v20  ;;  %1343 = vmatprep.subr.bf16.mxu1 %v1583_v1 }
 0x13c   :  { %447 = vmatpush1.bf16.msra.mxu0 %v1750_v22  ;;  %1344 = vmatpush3.bf16.msra.mxu1 %v1782_v27 }
 0x13d   :  { %549 = vmatprep.subr.bf16.mxu0 %v1624_v0  ;;  %1349 = vmatprep.subr.bf16.mxu1 %v1583_v1 }
 0x1df   :  { %v349_v25 = vpop.f32.mrf.mxu0  ;;  %v390_v28 = vpop.f32.mrf.mxu1 }
 0x1e0   :  { %v396_v29 = vadd.f32 %v349_v25, %v312_v63  ;;  %v410_v45 = vadd.f32 %v1826_v47, %v390_v28 }
 0x1e1   :  { %v351_v30 = vpop.f32.mrf.mxu0  ;;  %v1327_v31 = vpop.f32.mrf.mxu1 }
 0x1e2   :  { %v1170_v32 = vmul.f32 -1.442695, %v396_v29  ;;  %v397_v33 = vadd.f32 %v351_v30, %v313_v23 }
 0x1e3   :  { %v353_v34 = vpop.f32.mrf.mxu0  ;;  %v393_v35 = vpop.f32.mrf.mxu1 }
 0x1e4   :  { %1494 = vpow2.f32 %v1170_v32  ;;  %v1171_v36 = vmul.f32 -1.442695, %v397_v33 }
 0x1e5   :  { %v354_v37 = vpop.f32.mrf.mxu0  ;;  %v1328_v38 = vpop.f32.mrf.mxu1 }
 0x1e6   :  { %1496 = vpow2.f32 %v1171_v36 }
 0x1f1   :  { %v1495_v39 = vpop.eup %1494 }
 0x1f2   :  { %v404_v40 = vadd.f32 1.0, %v1495_v39  ;;  %v431_v39 = vunpack.c.h.bf16 %v1887_v43 }
 0x1f3   :  { %v1497_v41 = vpop.eup %1496 }
 0x1f4   :  { %1498 = vrcp.f32 %v404_v40  ;;  %v405_v42 = vadd.f32 1.0, %v1497_v41 }
 0x1f6   :  { %1500 = vrcp.f32 %v405_v42 }
 0x201   :  { %v1499_v46 = vpop.eup %1498 }
 0x202   :  { %v423_v48 = vpack.c.bf16 %v1499_v46, %v1499_v46  ;;  %v411_v49 = vmul.f32 %v1499_v46, %v410_v45 }
 0x203   :  { %v1501_v50 = vpop.eup %1500 }
 0x204   :  { %1174 = vst [vmem:[%s2237_s6 + $0x4] sm:$0xf] %v423_v48  ;;  %v412_v51 = vadd.f32 %v411_v49, %v314_v44  ;;  %v420_v52 = vpack.c.bf16 %v1501_v50, %v1501_v50 }
 0x206   :  { %1502 = vtanh.f32 %v412_v51  ;;  %1173 = vst [vmem:[%s2238_s5 + $0x4] sm:$0xf] %v420_v52 }
 0x213   :  { %v1503_v53 = vpop.eup %1502 }
 0x214   :  { %v414_v54 = vsub.f32 %v1839_v60, %v1503_v53  ;;  %v430_v60 = vunpack.c.h.bf16 %v1175_v58 }
 0x216   :  { %v415_v55 = vmul.f32 %v1501_v50, %v414_v54 }
 0x218   :  { %v1898_v56 = vadd.f32 %v1503_v53, %v415_v55  ;;  %v1182_v53 = vld [vmem:[%s2235_s0 + $0x24] sm:$0xff] }
 0x219   :  { %v546_v54 = vunpack.c.l.bf16 %v1182_v53  ;;  %v547_v55 = vunpack.c.h.bf16 %v1182_v53 }
 0x21a   :  { %v417_v57 = vpack.c.bf16 %v1898_v56, %v1898_v56 }
 0x21c   :  { %1172 = vst [vmem:[%s2239_s4 + $0x4] sm:$0xf] %v417_v57  ;;  %465 = vmatmul.mubr.bf16.vlgmr.msra.gmra.mxu0 %v417_v57  ;;  %1346 = vmatmul.mubr.bf16.vlgmr.msra.gmra.mxu1 %v417_v57 }
 0x21d   :  { %550 = vmatpush1.bf16.msra.mxu0 %v1631_v3  ;;  %1350 = vmatpush3.bf16.msra.mxu1 %v1668_v9 }
 0x21e   :  { %551 = vmatprep.subr.bf16.mxu0 %v1639_v4  ;;  %1351 = vmatprep.subr.bf16.mxu1 %v1583_v1 }
 0x21f   :  { %581 = vmatprep.mubr.bf16.mxu0 %v1584_v2  ;;  %1365 = vmatprep.mubr.msk.bf16.mxu1 %vm1585_vm0, %v1583_v1 }
 0x221   :  { %552 = vmatpush1.bf16.msra.mxu0 %v1645_v5  ;;  %1352 = vmatpush3.bf16.msra.mxu1 %v1686_v12 }
 0x222   :  { %553 = vmatprep.subr.bf16.mxu0 %v1651_v6  ;;  %1353 = vmatprep.subr.bf16.mxu1 %v1583_v1 }
 0x225   :  { %554 = vmatpush1.bf16.msra.mxu0 %v1657_v7  ;;  %1354 = vmatpush3.bf16.msra.mxu1 %v1705_v15 }
 0x226   :  { %555 = vmatprep.subr.bf16.mxu0 %v1663_v8  ;;  %1355 = vmatprep.subr.bf16.mxu1 %v1583_v1 }
 0x229   :  { %556 = vmatpush1.bf16.msra.mxu0 %v1674_v10  ;;  %1356 = vmatpush3.bf16.msra.mxu1 %v1724_v18 }
 0x22a   :  { %557 = vmatprep.subr.bf16.mxu0 %v1680_v11  ;;  %1357 = vmatprep.subr.bf16.mxu1 %v1583_v1 }
 0x22d   :  { %558 = vmatpush1.bf16.msra.mxu0 %v1692_v13  ;;  %1358 = vmatpush3.bf16.msra.mxu1 %v1743_v21 }
 0x22e   :  { %559 = vmatprep.subr.bf16.mxu0 %v1698_v14  ;;  %1359 = vmatprep.subr.bf16.mxu1 %v1583_v1 }
 0x231   :  { %560 = vmatpush1.bf16.msra.mxu0 %v1712_v16  ;;  %1360 = vmatpush3.bf16.msra.mxu1 %v1762_v24 }
 0x232   :  { %561 = vmatprep.subr.bf16.mxu0 %v1718_v17  ;;  %1361 = vmatprep.subr.bf16.mxu1 %v1583_v1 }
 0x235   :  { %562 = vmatpush1.bf16.msra.mxu0 %v1731_v19  ;;  %1362 = vmatpush3.bf16.msra.mxu1 %v1772_v26 }
 0x236   :  { %563 = vmatprep.subr.bf16.mxu0 %v1737_v20  ;;  %1363 = vmatprep.subr.bf16.mxu1 %v1583_v1 }
 0x239   :  { %564 = vmatpush1.bf16.msra.mxu0 %v1750_v22  ;;  %1364 = vmatpush3.bf16.msra.mxu1 %v1782_v27 }
 0x23a   :  { %666 = vmatprep.subr.bf16.mxu0 %v1624_v0  ;;  %1369 = vmatprep.subr.bf16.mxu1 %v1583_v1 }
 0x2dc   :  { %v466_v61 = vpop.f32.mrf.mxu0  ;;  %v507_v62 = vpop.f32.mrf.mxu1 }
 0x2dd   :  { %v513_v63 = vadd.f32 %v466_v61, %v429_v59  ;;  %v527_v40 = vadd.f32 %v1826_v47, %v507_v62 }
 0x2de   :  { %v468_v23 = vpop.f32.mrf.mxu0  ;;  %v1347_v25 = vpop.f32.mrf.mxu1 }
 0x2df   :  { %v1177_v28 = vmul.f32 -1.442695, %v513_v63  ;;  %v514_v29 = vadd.f32 %v468_v23, %v430_v60 }
 0x2e0   :  { %v470_v30 = vpop.f32.mrf.mxu0  ;;  %v510_v31 = vpop.f32.mrf.mxu1 }
 0x2e1   :  { %1504 = vpow2.f32 %v1177_v28  ;;  %v1178_v32 = vmul.f32 -1.442695, %v514_v29 }
 0x2e2   :  { %v471_v33 = vpop.f32.mrf.mxu0  ;;  %v1348_v34 = vpop.f32.mrf.mxu1 }
 0x2e3   :  { %1506 = vpow2.f32 %v1178_v32  ;;  %v2000_v34 = vld [vmem:[%s2235_s0 + $0x2c] ss:$12 sps:$4 sm:$0xff]  }
 0x2ee   :  { %v1505_v35 = vpop.eup %1504 }
 0x2ef   :  { %v521_v36 = vadd.f32 1.0, %v1505_v35  ;;  %v548_v35 = vunpack.c.l.bf16 %v2000_v34 }
 0x2f0   :  { %v1507_v37 = vpop.eup %1506 }
 0x2f1   :  { %1508 = vrcp.f32 %v521_v36  ;;  %v522_v38 = vadd.f32 1.0, %v1507_v37 }
 0x2f3   :  { %1510 = vrcp.f32 %v522_v38 }
 0x2fe   :  { %v1509_v41 = vpop.eup %1508 }
 0x2ff   :  { %v540_v42 = vpack.c.bf16 %v1509_v41, %v1509_v41  ;;  %v528_v44 = vmul.f32 %v1509_v41, %v527_v40 }
 0x300   :  { %v1511_v45 = vpop.eup %1510 }
 0x301   :  { %1181 = vst [vmem:[%s2237_s6 + $0x8] sm:$0xf] %v540_v42  ;;  %v529_v46 = vadd.f32 %v528_v44, %v431_v39  ;;  %v537_v48 = vpack.c.bf16 %v1511_v45, %v1511_v45 }
 0x303   :  { %1512 = vtanh.f32 %v529_v46  ;;  %1180 = vst [vmem:[%s2238_s5 + $0x8] sm:$0xf] %v537_v48 }
 0x310   :  { %v1513_v49 = vpop.eup %1512 }
 0x311   :  { %v531_v43 = vsub.f32 %v1898_v56, %v1513_v49 }
 0x313   :  { %v532_v50 = vmul.f32 %v1511_v45, %v531_v43  ;;  %v1189_v43 = vld [vmem:[%s2235_s0 + $0x30] sm:$0xff] }
 0x315   :  { %v1952_v51 = vadd.f32 %v1513_v49, %v532_v50  ;;  %v663_v50 = vunpack.c.l.bf16 %v1189_v43 }
 0x317   :  { %v534_v52 = vpack.c.bf16 %v1952_v51, %v1952_v51 }
 0x319   :  { %1179 = vst [vmem:[%s2239_s4 + $0x8] sm:$0xf] %v534_v52  ;;  %582 = vmatmul.mubr.bf16.vlgmr.msra.gmra.mxu0 %v534_v52  ;;  %1366 = vmatmul.mubr.bf16.vlgmr.msra.gmra.mxu1 %v534_v52 }
 0x31a   :  { %667 = vmatpush1.bf16.msra.mxu0 %v1631_v3  ;;  %1370 = vmatpush3.bf16.msra.mxu1 %v1668_v9 }
 0x31b   :  { %668 = vmatprep.subr.bf16.mxu0 %v1639_v4  ;;  %1371 = vmatprep.subr.bf16.mxu1 %v1583_v1 }
 0x31c   :  { %698 = vmatprep.mubr.bf16.mxu0 %v1584_v2  ;;  %1385 = vmatprep.mubr.msk.bf16.mxu1 %vm1585_vm0, %v1583_v1 }
 0x31e   :  { %669 = vmatpush1.bf16.msra.mxu0 %v1645_v5  ;;  %1372 = vmatpush3.bf16.msra.mxu1 %v1686_v12 }
 0x31f   :  { %670 = vmatprep.subr.bf16.mxu0 %v1651_v6  ;;  %1373 = vmatprep.subr.bf16.mxu1 %v1583_v1 }
 0x322   :  { %671 = vmatpush1.bf16.msra.mxu0 %v1657_v7  ;;  %1374 = vmatpush3.bf16.msra.mxu1 %v1705_v15 }
 0x323   :  { %672 = vmatprep.subr.bf16.mxu0 %v1663_v8  ;;  %1375 = vmatprep.subr.bf16.mxu1 %v1583_v1 }
 0x326   :  { %673 = vmatpush1.bf16.msra.mxu0 %v1674_v10  ;;  %1376 = vmatpush3.bf16.msra.mxu1 %v1724_v18 }
 0x327   :  { %674 = vmatprep.subr.bf16.mxu0 %v1680_v11  ;;  %1377 = vmatprep.subr.bf16.mxu1 %v1583_v1 }
 0x32a   :  { %675 = vmatpush1.bf16.msra.mxu0 %v1692_v13  ;;  %1378 = vmatpush3.bf16.msra.mxu1 %v1743_v21 }
 0x32b   :  { %676 = vmatprep.subr.bf16.mxu0 %v1698_v14  ;;  %1379 = vmatprep.subr.bf16.mxu1 %v1583_v1 }
 0x32e   :  { %677 = vmatpush1.bf16.msra.mxu0 %v1712_v16  ;;  %1380 = vmatpush3.bf16.msra.mxu1 %v1762_v24 }
 0x32f   :  { %678 = vmatprep.subr.bf16.mxu0 %v1718_v17  ;;  %1381 = vmatprep.subr.bf16.mxu1 %v1583_v1 }
 0x332   :  { %679 = vmatpush1.bf16.msra.mxu0 %v1731_v19  ;;  %1382 = vmatpush3.bf16.msra.mxu1 %v1772_v26 }
 0x333   :  { %680 = vmatprep.subr.bf16.mxu0 %v1737_v20  ;;  %1383 = vmatprep.subr.bf16.mxu1 %v1583_v1 }
 0x336   :  { %681 = vmatpush1.bf16.msra.mxu0 %v1750_v22  ;;  %1384 = vmatpush3.bf16.msra.mxu1 %v1782_v27 }
 0x337   :  { %783 = vmatprep.subr.bf16.mxu0 %v1624_v0  ;;  %1389 = vmatprep.subr.bf16.mxu1 %v1583_v1 }
 0x3d9   :  { %v583_v56 = vpop.f32.mrf.mxu0  ;;  %v624_v57 = vpop.f32.mrf.mxu1 }
 0x3da   :  { %v630_v58 = vadd.f32 %v583_v56, %v546_v54  ;;  %v644_v36 = vadd.f32 %v1826_v47, %v624_v57 }
 0x3db   :  { %v585_v59 = vpop.f32.mrf.mxu0  ;;  %v1367_v60 = vpop.f32.mrf.mxu1 }
 0x3dc   :  { %v1184_v61 = vmul.f32 -1.442695, %v630_v58  ;;  %v631_v62 = vadd.f32 %v585_v59, %v547_v55 }
 0x3dd   :  { %v587_v63 = vpop.f32.mrf.mxu0  ;;  %v627_v23 = vpop.f32.mrf.mxu1 }
 0x3de   :  { %1514 = vpow2.f32 %v1184_v61  ;;  %v1185_v25 = vmul.f32 -1.442695, %v631_v62 }
 0x3df   :  { %v588_v28 = vpop.f32.mrf.mxu0  ;;  %v1368_v29 = vpop.f32.mrf.mxu1 }
 0x3e0   :  { %1516 = vpow2.f32 %v1185_v25  ;;  %v665_v29 = vunpack.c.h.bf16 %v2000_v34 }
 0x3eb   :  { %v1515_v30 = vpop.eup %1514 }
 0x3ec   :  { %v638_v31 = vadd.f32 1.0, %v1515_v30 }
 0x3ed   :  { %v1517_v32 = vpop.eup %1516 }
 0x3ee   :  { %1518 = vrcp.f32 %v638_v31  ;;  %v639_v33 = vadd.f32 1.0, %v1517_v32 }
 0x3f0   :  { %1520 = vrcp.f32 %v639_v33 }
 0x3fb   :  { %v1519_v37 = vpop.eup %1518 }
 0x3fc   :  { %v657_v38 = vpack.c.bf16 %v1519_v37, %v1519_v37  ;;  %v645_v39 = vmul.f32 %v1519_v37, %v644_v36 }
 0x3fd   :  { %v1521_v40 = vpop.eup %1520 }
 0x3fe   :  { %1188 = vst [vmem:[%s2237_s6 + $0xc] sm:$0xf] %v657_v38  ;;  %v646_v41 = vadd.f32 %v645_v39, %v548_v35  ;;  %v654_v42 = vpack.c.bf16 %v1521_v40, %v1521_v40 }
 0x400   :  { %1522 = vtanh.f32 %v646_v41  ;;  %1187 = vst [vmem:[%s2238_s5 + $0xc] sm:$0xf] %v654_v42 }
 0x40d   :  { %v1523_v44 = vpop.eup %1522 }
 0x40e   :  { %v648_v45 = vsub.f32 %v1952_v51, %v1523_v44  ;;  %v664_v51 = vunpack.c.h.bf16 %v1189_v43 }
 0x410   :  { %v649_v46 = vmul.f32 %v1521_v40, %v648_v45  ;;  %v2115_v45 = vld [vmem:[%s2235_s0 + $0x44] ss:$12 sps:$4 sm:$0xff]  }
 0x412   :  { %v2011_v48 = vadd.f32 %v1523_v44, %v649_v46  ;;  %v782_v46 = vunpack.c.l.bf16 %v2115_v45 }
 0x414   :  { %v651_v49 = vpack.c.bf16 %v2011_v48, %v2011_v48 }
 0x416   :  { %1186 = vst [vmem:[%s2239_s4 + $0xc] sm:$0xf] %v651_v49  ;;  %699 = vmatmul.mubr.bf16.vlgmr.msra.gmra.mxu0 %v651_v49  ;;  %1386 = vmatmul.mubr.bf16.vlgmr.msra.gmra.mxu1 %v651_v49 }
 0x417   :  { %784 = vmatpush1.bf16.msra.mxu0 %v1631_v3  ;;  %1390 = vmatpush3.bf16.msra.mxu1 %v1668_v9 }
 0x418   :  { %785 = vmatprep.subr.bf16.mxu0 %v1639_v4  ;;  %1391 = vmatprep.subr.bf16.mxu1 %v1583_v1 }
 0x419   :  { %815 = vmatprep.mubr.bf16.mxu0 %v1584_v2  ;;  %1405 = vmatprep.mubr.msk.bf16.mxu1 %vm1585_vm0, %v1583_v1 }
 0x41b   :  { %786 = vmatpush1.bf16.msra.mxu0 %v1645_v5  ;;  %1392 = vmatpush3.bf16.msra.mxu1 %v1686_v12 }
 0x41c   :  { %787 = vmatprep.subr.bf16.mxu0 %v1651_v6  ;;  %1393 = vmatprep.subr.bf16.mxu1 %v1583_v1 }
 0x41f   :  { %788 = vmatpush1.bf16.msra.mxu0 %v1657_v7  ;;  %1394 = vmatpush3.bf16.msra.mxu1 %v1705_v15 }
 0x420   :  { %789 = vmatprep.subr.bf16.mxu0 %v1663_v8  ;;  %1395 = vmatprep.subr.bf16.mxu1 %v1583_v1 }
 0x423   :  { %790 = vmatpush1.bf16.msra.mxu0 %v1674_v10  ;;  %1396 = vmatpush3.bf16.msra.mxu1 %v1724_v18 }
 0x424   :  { %791 = vmatprep.subr.bf16.mxu0 %v1680_v11  ;;  %1397 = vmatprep.subr.bf16.mxu1 %v1583_v1 }
 0x427   :  { %792 = vmatpush1.bf16.msra.mxu0 %v1692_v13  ;;  %1398 = vmatpush3.bf16.msra.mxu1 %v1743_v21 }
 0x428   :  { %793 = vmatprep.subr.bf16.mxu0 %v1698_v14  ;;  %1399 = vmatprep.subr.bf16.mxu1 %v1583_v1 }
 0x42b   :  { %794 = vmatpush1.bf16.msra.mxu0 %v1712_v16  ;;  %1400 = vmatpush3.bf16.msra.mxu1 %v1762_v24 }
 0x42c   :  { %795 = vmatprep.subr.bf16.mxu0 %v1718_v17  ;;  %1401 = vmatprep.subr.bf16.mxu1 %v1583_v1 }
 0x42f   :  { %796 = vmatpush1.bf16.msra.mxu0 %v1731_v19  ;;  %1402 = vmatpush3.bf16.msra.mxu1 %v1772_v26 }
 0x430   :  { %797 = vmatprep.subr.bf16.mxu0 %v1737_v20  ;;  %1403 = vmatprep.subr.bf16.mxu1 %v1583_v1 }
 0x433   :  { %798 = vmatpush1.bf16.msra.mxu0 %v1750_v22  ;;  %1404 = vmatpush3.bf16.msra.mxu1 %v1782_v27 }
 0x434   :  { %900 = vmatprep.subr.bf16.mxu0 %v1624_v0  ;;  %1409 = vmatprep.subr.bf16.mxu1 %v1583_v1 }
 0x4d6   :  { %v700_v52 = vpop.f32.mrf.mxu0  ;;  %v741_v53 = vpop.f32.mrf.mxu1 }
 0x4d7   :  { %v747_v54 = vadd.f32 %v700_v52, %v663_v50  ;;  %v761_v30 = vadd.f32 %v1826_v47, %v741_v53 }
 0x4d8   :  { %v702_v55 = vpop.f32.mrf.mxu0  ;;  %v1387_v56 = vpop.f32.mrf.mxu1 }
 0x4d9   :  { %v1191_v57 = vmul.f32 -1.442695, %v747_v54  ;;  %v748_v58 = vadd.f32 %v702_v55, %v664_v51 }
 0x4da   :  { %v704_v59 = vpop.f32.mrf.mxu0  ;;  %v744_v60 = vpop.f32.mrf.mxu1 }
 0x4db   :  { %1524 = vpow2.f32 %v1191_v57  ;;  %v1192_v61 = vmul.f32 -1.442695, %v748_v58  ;;  %v1565_v59 = vld [vmem:[%s2233_s2 + $0xa8] ss:$12 sps:$4 sm:$0xff]   ;;  %v1566_v60 = vld [vmem:[%s2233_s2 + $0xb0] ss:$12 sps:$4 sm:$0xff]  }
 0x4dc   :  { %v705_v0 = vpop.f32.mrf.mxu0  ;;  %v1388_v62 = vpop.f32.mrf.mxu1 }
 0x4dd   :  { %1526 = vpow2.f32 %v1192_v61  ;;  %v1567_v61 = vld [vmem:[%s2233_s2 + $0x94] ss:$12 sps:$4 sm:$0xff]   ;;  %v1568_v0 = vld [vmem:[%s2233_s2 + $0x90] ss:$12 sps:$4 sm:$0xff]   ;;  %v1569_v62 = vld [vmem:[%s2233_s2 + $0x98] ss:$12 sps:$4 sm:$0xff]  }
 0x4e8   :  { %v1525_v63 = vpop.eup %1524 }
 0x4e9   :  { %v755_v23 = vadd.f32 1.0, %v1525_v63  ;;  %v1570_v63 = vld [vmem:[%s2233_s2 + $0x7c] ss:$12 sps:$4 sm:$0xff]  }
 0x4ea   :  { %v1527_v25 = vpop.eup %1526 }
 0x4eb   :  { %1528 = vrcp.f32 %v755_v23  ;;  %v756_v28 = vadd.f32 1.0, %v1527_v25  ;;  %v1572_v23 = vld [vmem:[%s2233_s2 + $0x80] ss:$12 sps:$4 sm:$0xff]   ;;  %v1573_v25 = vld [vmem:[%s2233_s2 + $0x64] ss:$12 sps:$4 sm:$0xff]  }
 0x4ed   :  { %1530 = vrcp.f32 %v756_v28  ;;  %v1574_v28 = vld [vmem:[%s2233_s2 + $0x60] ss:$12 sps:$4 sm:$0xff]  }
 0x4f8   :  { %v1529_v31 = vpop.eup %1528 }
 0x4f9   :  { %v774_v32 = vpack.c.bf16 %v1529_v31, %v1529_v31  ;;  %v762_v33 = vmul.f32 %v1529_v31, %v761_v30  ;;  %v1576_v30 = vld [vmem:[%s2233_s2 + $0x48] ss:$12 sps:$4 sm:$0xff]  }
 0x4fa   :  { %v1531_v35 = vpop.eup %1530  ;;  %v1577_v31 = vld [vmem:[%s2233_s2 + $0x34] ss:$12 sps:$4 sm:$0xff]  }
 0x4fb   :  { %1195 = vst [vmem:[%s2237_s6 + $0x10] sm:$0xf] %v774_v32  ;;  %v763_v36 = vadd.f32 %v762_v33, %v665_v29  ;;  %v771_v37 = vpack.c.bf16 %v1531_v35, %v1531_v35  ;;  %v1575_v29 = vld [vmem:[%s2233_s2 + $0x4c] ss:$12 sps:$4 sm:$0xff]   ;;  %v1579_v32 = vld [vmem:[%s2233_s2 + $0x1c] ss:$12 sps:$4 sm:$0xff]  }
 0x4fc   :  { %v1581_v33 = vld [vmem:[%s2233_s2 + $0x4] ss:$12 sps:$4 sm:$0xff]  }
 0x4fd   :  { %1532 = vtanh.f32 %v763_v36  ;;  %1194 = vst [vmem:[%s2238_s5 + $0x10] sm:$0xf] %v771_v37 }
 0x50a   :  { %v1533_v38 = vpop.eup %1532 }
 0x50b   :  { %v765_v34 = vsub.f32 %v2011_v48, %v1533_v38 }
 0x50d   :  { %v766_v39 = vmul.f32 %v1531_v35, %v765_v34  ;;  %v1203_v35 = vld [vmem:[%s2235_s0 + $0x48] sm:$0xff] }
 0x50e   :  { %v897_v36 = vunpack.c.l.bf16 %v1203_v35 }
 0x50f   :  { %v2065_v40 = vadd.f32 %v1533_v38, %v766_v39 }
 0x511   :  { %v768_v41 = vpack.c.bf16 %v2065_v40, %v2065_v40 }
 0x513   :  { %1193 = vst [vmem:[%s2239_s4 + $0x10] sm:$0xf] %v768_v41  ;;  %816 = vmatmul.mubr.bf16.vlgmr.msra.gmra.mxu0 %v768_v41  ;;  %1406 = vmatmul.mubr.bf16.vlgmr.msra.gmra.mxu1 %v768_v41 }
 0x514   :  { %901 = vmatpush1.bf16.msra.mxu0 %v1631_v3  ;;  %1410 = vmatpush3.bf16.msra.mxu1 %v1668_v9  ;;  %v1564_v3 = vld [vmem:[%s2233_s2 + $0xac] ss:$12 sps:$4 sm:$0xff]  }
 0x515   :  { %902 = vmatprep.subr.bf16.mxu0 %v1639_v4  ;;  %1411 = vmatprep.subr.bf16.mxu1 %v1583_v1  ;;  %v1196_v4 = vld [vmem:[%s2235_s0 + $0x3c] sm:$0xff] }
 0x516   :  { %932 = vmatprep.mubr.bf16.mxu0 %v1584_v2  ;;  %1425 = vmatprep.mubr.msk.bf16.mxu1 %vm1585_vm0, %v1583_v1 }
 0x518   :  { %903 = vmatpush1.bf16.msra.mxu0 %v1645_v5  ;;  %1412 = vmatpush3.bf16.msra.mxu1 %v1686_v12  ;;  %v780_v5 = vunpack.c.l.bf16 %v1196_v4 }
 0x519   :  { %904 = vmatprep.subr.bf16.mxu0 %v1651_v6  ;;  %1413 = vmatprep.subr.bf16.mxu1 %v1583_v1  ;;  %v781_v6 = vunpack.c.h.bf16 %v1196_v4 }
 0x51c   :  { %905 = vmatpush1.bf16.msra.mxu0 %v1657_v7  ;;  %1414 = vmatpush3.bf16.msra.mxu1 %v1705_v15 }
 0x51d   :  { %906 = vmatprep.subr.bf16.mxu0 %v1663_v8  ;;  %1415 = vmatprep.subr.bf16.mxu1 %v1583_v1 }
 0x520   :  { %907 = vmatpush1.bf16.msra.mxu0 %v1674_v10  ;;  %1416 = vmatpush3.bf16.msra.mxu1 %v1724_v18 }
 0x521   :  { %908 = vmatprep.subr.bf16.mxu0 %v1680_v11  ;;  %1417 = vmatprep.subr.bf16.mxu1 %v1583_v1 }
 0x524   :  { %909 = vmatpush1.bf16.msra.mxu0 %v1692_v13  ;;  %1418 = vmatpush3.bf16.msra.mxu1 %v1743_v21 }
 0x525   :  { %910 = vmatprep.subr.bf16.mxu0 %v1698_v14  ;;  %1419 = vmatprep.subr.bf16.mxu1 %v1583_v1 }
 0x528   :  { %911 = vmatpush1.bf16.msra.mxu0 %v1712_v16  ;;  %1420 = vmatpush3.bf16.msra.mxu1 %v1762_v24 }
 0x529   :  { %912 = vmatprep.subr.bf16.mxu0 %v1718_v17  ;;  %1421 = vmatprep.subr.bf16.mxu1 %v1583_v1 }
 0x52c   :  { %913 = vmatpush1.bf16.msra.mxu0 %v1731_v19  ;;  %1422 = vmatpush3.bf16.msra.mxu1 %v1772_v26 }
 0x52d   :  { %914 = vmatprep.subr.bf16.mxu0 %v1737_v20  ;;  %1423 = vmatprep.subr.bf16.mxu1 %v1583_v1 }
 0x530   :  { %915 = vmatpush1.bf16.msra.mxu0 %v1750_v22  ;;  %1424 = vmatpush3.bf16.msra.mxu1 %v1782_v27 }
 0x531   :  { %1017 = vmatprep.subr.bf16.mxu0 %v1564_v3  ;;  %1429 = vmatprep.subr.bf16.mxu1 %v1583_v1 }
 0x5d3   :  { %v817_v7 = vpop.f32.mrf.mxu0  ;;  %v858_v8 = vpop.f32.mrf.mxu1 }
 0x5d4   :  { %v864_v9 = vadd.f32 %v817_v7, %v780_v5  ;;  %v878_v48 = vadd.f32 %v1826_v47, %v858_v8 }
 0x5d5   :  { %v819_v10 = vpop.f32.mrf.mxu0  ;;  %v1407_v11 = vpop.f32.mrf.mxu1 }
 0x5d6   :  { %v1198_v12 = vmul.f32 -1.442695, %v864_v9  ;;  %v865_v13 = vadd.f32 %v819_v10, %v781_v6  ;;  %v899_v11 = vunpack.c.h.bf16 %v2115_v45 }
 0x5d7   :  { %v821_v14 = vpop.f32.mrf.mxu0  ;;  %v861_v15 = vpop.f32.mrf.mxu1 }
 0x5d8   :  { %1534 = vpow2.f32 %v1198_v12  ;;  %v1199_v16 = vmul.f32 -1.442695, %v865_v13 }
 0x5d9   :  { %v822_v17 = vpop.f32.mrf.mxu0  ;;  %v1408_v19 = vpop.f32.mrf.mxu1 }
 0x5da   :  { %1536 = vpow2.f32 %v1199_v16 }
 0x5e5   :  { %v1535_v20 = vpop.eup %1534 }
 0x5e6   :  { %v872_v22 = vadd.f32 1.0, %v1535_v20 }
 0x5e7   :  { %v1537_v42 = vpop.eup %1536 }
 0x5e8   :  { %1538 = vrcp.f32 %v872_v22  ;;  %v873_v44 = vadd.f32 1.0, %v1537_v42 }
 0x5ea   :  { %1540 = vrcp.f32 %v873_v44 }
 0x5f5   :  { %v1539_v49 = vpop.eup %1538 }
 0x5f6   :  { %v891_v43 = vpack.c.bf16 %v1539_v49, %v1539_v49  ;;  %v879_v50 = vmul.f32 %v1539_v49, %v878_v48 }
 0x5f7   :  { %v1541_v51 = vpop.eup %1540 }
 0x5f8   :  { %1202 = vst [vmem:[%s2237_s6 + $0x14] sm:$0xf] %v891_v43  ;;  %v880_v52 = vadd.f32 %v879_v50, %v782_v46  ;;  %v888_v53 = vpack.c.bf16 %v1541_v51, %v1541_v51  ;;  %v1210_v46 = vld [vmem:[%s2235_s0 + $0x54] sm:$0xff] }
 0x5f9   :  { %v1014_v48 = vunpack.c.l.bf16 %v1210_v46  ;;  %v1015_v49 = vunpack.c.h.bf16 %v1210_v46 }
 0x5fa   :  { %1542 = vtanh.f32 %v880_v52  ;;  %1201 = vst [vmem:[%s2238_s5 + $0x14] sm:$0xf] %v888_v53 }
 0x607   :  { %v1543_v54 = vpop.eup %1542 }
 0x608   :  { %v882_v55 = vsub.f32 %v2065_v40, %v1543_v54 }
 0x60a   :  { %v883_v56 = vmul.f32 %v1541_v51, %v882_v55 }
 0x60c   :  { %v2126_v57 = vadd.f32 %v1543_v54, %v883_v56 }
 0x60e   :  { %v885_v58 = vpack.c.bf16 %v2126_v57, %v2126_v57 }
 0x610   :  { %1200 = vst [vmem:[%s2239_s4 + $0x14] sm:$0xf] %v885_v58  ;;  %933 = vmatmul.mubr.bf16.vlgmr.msra.gmra.mxu0 %v885_v58  ;;  %1426 = vmatmul.mubr.bf16.vlgmr.msra.gmra.mxu1 %v885_v58 }
 0x611   :  { %1018 = vmatpush1.bf16.msra.mxu0 %v1565_v59  ;;  %1430 = vmatpush3.bf16.msra.mxu1 %v1566_v60 }
 0x612   :  { %1019 = vmatprep.subr.bf16.mxu0 %v1567_v61  ;;  %1431 = vmatprep.subr.bf16.mxu1 %v1583_v1 }
 0x613   :  { %1049 = vmatprep.mubr.bf16.mxu0 %v1584_v2  ;;  %1445 = vmatprep.mubr.msk.bf16.mxu1 %vm1585_vm0, %v1583_v1  ;;  %v1571_v2 = vld [vmem:[%s2233_s2 + $0x78] ss:$12 sps:$4 sm:$0xff]  }
 0x615   :  { %1020 = vmatpush1.bf16.msra.mxu0 %v1568_v0  ;;  %1432 = vmatpush3.bf16.msra.mxu1 %v1569_v62 }
 0x616   :  { %1021 = vmatprep.subr.bf16.mxu0 %v1570_v63  ;;  %1433 = vmatprep.subr.bf16.mxu1 %v1583_v1 }
 0x619   :  { %1022 = vmatpush1.bf16.msra.mxu0 %v1571_v2  ;;  %1434 = vmatpush3.bf16.msra.mxu1 %v1572_v23  ;;  %v1211_v2 = vld [vmem:[%s2235_s0 + $0x5c] sm:$0xf] }
 0x61a   :  { %1023 = vmatprep.subr.bf16.mxu0 %v1573_v25  ;;  %1435 = vmatprep.subr.bf16.mxu1 %v1583_v1  ;;  %v1016_v23 = vunpack.c.l.bf16 %v1211_v2 }
 0x61d   :  { %1024 = vmatpush1.bf16.msra.mxu0 %v1574_v28  ;;  %1436 = vmatpush3.bf16.msra.mxu1 %v1724_v18  ;;  %v1578_v18 = vld [vmem:[%s2233_s2 + $0x30] ss:$12 sps:$4 sm:$0xff]  }
 0x61e   :  { %1025 = vmatprep.subr.bf16.mxu0 %v1575_v29  ;;  %1437 = vmatprep.subr.bf16.mxu1 %v1583_v1 }
 0x621   :  { %1026 = vmatpush1.bf16.msra.mxu0 %v1576_v30  ;;  %1438 = vmatpush3.bf16.msra.mxu1 %v1743_v21  ;;  %v1580_v21 = vld [vmem:[%s2233_s2 + $0x18] ss:$12 sps:$4 sm:$0xff]  }
 0x622   :  { %1027 = vmatprep.subr.bf16.mxu0 %v1577_v31  ;;  %1439 = vmatprep.subr.bf16.mxu1 %v1583_v1 }
 0x625   :  { %1028 = vmatpush1.bf16.msra.mxu0 %v1578_v18  ;;  %1440 = vmatpush3.bf16.msra.mxu1 %v1762_v24  ;;  %v1582_v24 = vld [vmem:[%s2233_s2] ss:$12 sps:$4 sm:$0xff]  }
 0x626   :  { %1029 = vmatprep.subr.bf16.mxu0 %v1579_v32  ;;  %1441 = vmatprep.subr.bf16.mxu1 %v1583_v1 }
 0x629   :  { %1030 = vmatpush1.bf16.msra.mxu0 %v1580_v21  ;;  %1442 = vmatpush3.bf16.msra.mxu1 %v1772_v26  ;;  %v898_v26 = vunpack.c.h.bf16 %v1203_v35 }
 0x62a   :  { %1031 = vmatprep.subr.bf16.mxu0 %v1581_v33  ;;  %1443 = vmatprep.subr.bf16.mxu1 %v1583_v1 }
 0x62d   :  { %1032 = vmatpush1.bf16.msra.mxu0 %v1582_v24  ;;  %1444 = vmatpush3.bf16.msra.mxu1 %v1782_v27 }
 0x6d0   :  { %v934_v37 = vpop.f32.mrf.mxu0  ;;  %v975_v38 = vpop.f32.mrf.mxu1 }
 0x6d1   :  { %v981_v34 = vadd.f32 %v934_v37, %v897_v36  ;;  %v995_v12 = vadd.f32 %v1826_v47, %v975_v38 }
 0x6d2   :  { %v936_v39 = vpop.f32.mrf.mxu0  ;;  %v1427_v40 = vpop.f32.mrf.mxu1 }
 0x6d3   :  { %v1205_v41 = vmul.f32 -1.442695, %v981_v34  ;;  %v982_v1 = vadd.f32 %v936_v39, %v898_v26 }
 0x6d4   :  { %v938_v3 = vpop.f32.mrf.mxu0  ;;  %v978_v4 = vpop.f32.mrf.mxu1 }
 0x6d5   :  { %1544 = vpow2.f32 %v1205_v41  ;;  %v1206_v5 = vmul.f32 -1.442695, %v982_v1 }
 0x6d6   :  { %v939_v6 = vpop.f32.mrf.mxu0  ;;  %v1428_v7 = vpop.f32.mrf.mxu1 }
 0x6d7   :  { %1546 = vpow2.f32 %v1206_v5 }
 0x6e2   :  { %v1545_v27 = vpop.eup %1544 }
 0x6e3   :  { %v989_v8 = vadd.f32 1.0, %v1545_v27 }
 0x6e4   :  { %v1547_v9 = vpop.eup %1546 }
 0x6e5   :  { %1548 = vrcp.f32 %v989_v8  ;;  %v990_v10 = vadd.f32 1.0, %v1547_v9 }
 0x6e7   :  { %1550 = vrcp.f32 %v990_v10 }
 0x6f2   :  { %v1549_v13 = vpop.eup %1548 }
 0x6f3   :  { %v1008_v14 = vpack.c.bf16 %v1549_v13, %v1549_v13  ;;  %v996_v15 = vmul.f32 %v1549_v13, %v995_v12 }
 0x6f4   :  { %v1551_v16 = vpop.eup %1550 }
 0x6f5   :  { %1209 = vst [vmem:[%s2237_s6 + $0x18] sm:$0xf] %v1008_v14  ;;  %v997_v17 = vadd.f32 %v996_v15, %v899_v11  ;;  %v1005_v19 = vpack.c.bf16 %v1551_v16, %v1551_v16 }
 0x6f7   :  { %1552 = vtanh.f32 %v997_v17  ;;  %1208 = vst [vmem:[%s2238_s5 + $0x18] sm:$0xf] %v1005_v19 }
 0x704   :  { %v1553_v20 = vpop.eup %1552 }
 0x705   :  { %v999_v22 = vsub.f32 %v2126_v57, %v1553_v20 }
 0x707   :  { %v1000_v42 = vmul.f32 %v1551_v16, %v999_v22 }
 0x709   :  { %v1001_v44 = vadd.f32 %v1553_v20, %v1000_v42 }
 0x70b   :  { %v1002_v45 = vpack.c.bf16 %v1001_v44, %v1001_v44 }
 0x70d   :  { %1207 = vst [vmem:[%s2239_s4 + $0x18] sm:$0xf] %v1002_v45  ;;  %1050 = vmatmul.mubr.bf16.vlgmr.msra.gmra.mxu0 %v1002_v45  ;;  %1446 = vmatmul.mubr.bf16.vlgmr.msra.gmra.mxu1 %v1002_v45 }
 0x7cd   :  { %v1051_v43 = vpop.f32.mrf.mxu0  ;;  %v1092_v50 = vpop.f32.mrf.mxu1 }
 0x7ce   :  { %v1098_v51 = vadd.f32 %v1051_v43, %v1014_v48  ;;  %v1112_v25 = vadd.f32 %v1826_v47, %v1092_v50 }
 0x7cf   :  { %v1053_v52 = vpop.f32.mrf.mxu0  ;;  %v1447_v53 = vpop.f32.mrf.mxu1 }
 0x7d0   :  { %v1212_v54 = vmul.f32 -1.442695, %v1098_v51  ;;  %v1099_v55 = vadd.f32 %v1053_v52, %v1015_v49 }
 0x7d1   :  { %v1055_v56 = vpop.f32.mrf.mxu0  ;;  %v1095_v57 = vpop.f32.mrf.mxu1 }
 0x7d2   :  { %1554 = vpow2.f32 %v1212_v54  ;;  %v1213_v58 = vmul.f32 -1.442695, %v1099_v55 }
 0x7d3   :  { %v1056_v59 = vpop.f32.mrf.mxu0  ;;  %v1448_v60 = vpop.f32.mrf.mxu1 }
 0x7d4   :  { %1556 = vpow2.f32 %v1213_v58 }
 0x7df   :  { %v1555_v61 = vpop.eup %1554 }
 0x7e0   :  { %v1106_v0 = vadd.f32 1.0, %v1555_v61 }
 0x7e1   :  { %v1557_v62 = vpop.eup %1556 }
 0x7e2   :  { %1558 = vrcp.f32 %v1106_v0  ;;  %v1107_v63 = vadd.f32 1.0, %v1557_v62 }
 0x7e4   :  { %1560 = vrcp.f32 %v1107_v63 }
 0x7ef   :  { %v1559_v28 = vpop.eup %1558 }
 0x7f0   :  { %v1125_v29 = vpack.c.bf16 %v1559_v28, %v1559_v28  ;;  %v1113_v30 = vmul.f32 %v1559_v28, %v1112_v25 }
 0x7f1   :  { %v1561_v31 = vpop.eup %1560 }
 0x7f2   :  { %1216 = vst [vmem:[%s2237_s6 + $0x1c] sm:$0xf] %v1125_v29  ;;  %v1114_v18 = vadd.f32 %v1113_v30, %v1016_v23  ;;  %v1122_v32 = vpack.c.bf16 %v1561_v31, %v1561_v31 }
 0x7f4   :  { %1562 = vtanh.f32 %v1114_v18  ;;  %1215 = vst [vmem:[%s2238_s5 + $0x1c] sm:$0xf] %v1122_v32 }
 0x801   :  { %v1563_v21 = vpop.eup %1562 }
 0x802   :  { %v1116_v33 = vsub.f32 %v1001_v44, %v1563_v21 }
 0x804   :  { %v1117_v24 = vmul.f32 %v1561_v31, %v1116_v33 }
 0x806   :  { %v1118_v35 = vadd.f32 %v1563_v21, %v1117_v24 }
 0x808   :  { %v1119_v47 = vpack.c.bf16 %v1118_v35, %v1118_v35 }
 0x80a   :  { %1214 = vst [vmem:[%s2239_s4 + $0x1c] sm:$0xf] %v1119_v47 }

</bundles_post_ra>
